<compile_context>
chip_gen: v6e
topology: v6e:2x2x1
jax: 0.10.0
libtpu: 0.0.40
codegen_flags: <defaults>
</compile_context>

<pallas_src>
import functools

import jax
import jax.numpy as jnp
from jax.experimental import pallas as pl
from jax.experimental.pallas import tpu as pltpu


def _silu(x):
    return x * jax.nn.sigmoid(x)


def _phi(x):
    # elu(x) + 1 == where(x > 0, x + 1, exp(x)): single transcendental.
    return jnp.where(x > 0, x + 1.0, jnp.exp(x))


# ---------------------------------------------------------------------------
# Kernel 1: KV / key-sum accumulation over sequence tiles.
#   grid = (B, S/T); batch "parallel", sequence "arbitrary" (reduction last).
# ---------------------------------------------------------------------------
def _kv_accum_kernel(k_ref, v_ref, wkv_ref, bkv_ref, kv_out_ref, ks_out_ref,
                     kv_acc, ks_acc, *, d_model):
    t = pl.program_id(1)

    @pl.when(t == 0)
    def _init():
        kv_acc[...] = jnp.zeros_like(kv_acc)
        ks_acc[...] = jnp.zeros_like(ks_acc)

    def gated_proj(x_ref, idx):
        # One fused (T, D) x (D, 2D) bf16 MXU matmul, f32 accumulate + bias.
        y = jnp.dot(x_ref[0], wkv_ref[idx],
                    preferred_element_type=jnp.float32) + bkv_ref[idx]
        return _silu(y[:, :d_model]) * y[:, d_model:]            # (T, D) f32

    k = gated_proj(k_ref, 0)
    v = gated_proj(v_ref, 1)
    phi_k = _phi(k)                                              # (T, D) f32

    # phi_k^T @ v without materializing a transpose (contract over axis 0).
    kv_acc[...] += jax.lax.dot_general(
        phi_k.astype(jnp.bfloat16), v.astype(jnp.bfloat16),
        dimension_numbers=(((0,), (0,)), ((), ())),
        preferred_element_type=jnp.float32)                      # (D, D) f32
    ks_acc[...] += jnp.sum(phi_k, axis=0, keepdims=True)         # (1, D) f32

    @pl.when(t == pl.num_programs(1) - 1)
    def _finalize():
        kv_out_ref[0] = kv_acc[...]
        ks_out_ref[0] = ks_acc[...]


# ---------------------------------------------------------------------------
# Kernel 2: per-query-tile attention + output projection.
#   grid = (B, S/T); both axes "parallel".
#   rhs = [KV*head_mask | (key_sum/S)*head_mask]  (D, 2D) bf16, so numerator
#   and head-broadcast denominator come out of ONE MXU matmul.
# ---------------------------------------------------------------------------
def _attn_out_kernel(q_ref, rhs_ref, wq_ref, bq_ref, wo_ref, bo_ref, o_ref,
                     *, d_model, denom_scale, eps):
    y = jnp.dot(q_ref[0], wq_ref[...],
                preferred_element_type=jnp.float32) + bq_ref[...]
    q = _silu(y[:, :d_model]) * y[:, d_model:]                   # (T, D) f32
    phi_q = _phi(q)

    fused = jnp.dot(phi_q.astype(jnp.bfloat16), rhs_ref[0],
                    preferred_element_type=jnp.float32)          # (T, 2D) f32
    numer = fused[:, :d_model]
    denom = fused[:, d_model:] * denom_scale                     # undo 1/S scale
    attn = numer * pl.reciprocal(denom + eps, approx=True)       # EUP reciprocal

    out = jnp.dot(attn.astype(jnp.bfloat16), wo_ref[...],
                  preferred_element_type=jnp.float32) + bo_ref[...]
    o_ref[0] = out.astype(o_ref.dtype)


# ---------------------------------------------------------------------------
# Host-side helpers.
# ---------------------------------------------------------------------------
def _fuse_params(params):
    """Fuse gate projections: q -> (D, 2D); k/v -> (2, D, 2D); biases stay f32."""
    wq = jnp.concatenate([params["wq1"], params["wq2"]], axis=1).astype(jnp.bfloat16)
    bq = jnp.concatenate([params["bq1"], params["bq2"]], axis=1)
    wkv = jnp.stack([
        jnp.concatenate([params["wk1"], params["wk2"]], axis=1),
        jnp.concatenate([params["wv1"], params["wv2"]], axis=1),
    ], axis=0).astype(jnp.bfloat16)
    bkv = jnp.stack([
        jnp.concatenate([params["bk1"], params["bk2"]], axis=1),
        jnp.concatenate([params["bv1"], params["bv2"]], axis=1),
    ], axis=0)
    return wq, bq, wkv, bkv, params["wo"].astype(jnp.bfloat16), params["bo"]


def _pick_seq_tile(seq_len, target=256):
    """Largest multiple-of-8 divisor of seq_len <= target (keeps blocks
    (8,128)-aligned / lane-dense); falls back to the full sequence."""
    if seq_len <= target:
        return seq_len
    t = (target // 8) * 8
    while t >= 8:
        if seq_len % t == 0:
            return t
        t -= 8
    return seq_len


def _vmem_ceiling_bytes():
    """Device-derived VMEM cap (64 MiB/TC on v7x, 128 MiB on v5e/v6e) with
    headroom for Mosaic internal scratch and pipeline buffers."""
    cap = 64 * 1024 * 1024  # conservative default = smallest per-TC (v7x)
    try:
        cap = int(getattr(pltpu.get_tpu_info(), "vmem_capacity_bytes", cap))
    except Exception:
        pass
    return max(8 * 1024 * 1024, (cap * 7) // 8)


def _weight_spec(shape, single_buffered):
    """Constant-index weight/bias spec; single-buffered when supported (the
    weights never change across the grid, so double-buffering wastes VMEM)."""
    zeros = (0,) * len(shape)

    def index_map(b, t):
        return zeros

    if single_buffered:
        return pl.BlockSpec(shape, index_map, pipeline_mode=pl.Buffered(1))
    return pl.BlockSpec(shape, index_map)


def _mhla_pallas(query, key, value, fused_params, num_heads, eps, seq_tile,
                 single_buffer_weights):
    B, S, D = query.shape
    d_k = D // num_heads
    wq, bq, wkv, bkv, wo, bo = fused_params

    # bf16 HBM I/O for the big activation slabs (the MXU eats bf16 anyway).
    q_b = query.astype(jnp.bfloat16)
    k_b = key.astype(jnp.bfloat16)
    v_b = value.astype(jnp.bfloat16)

    tile = seq_tile if seq_tile is not None else _pick_seq_tile(S)
    assert S % tile == 0, "sequence tile must divide the sequence length"
    n_tiles = S // tile

    ceiling = _vmem_ceiling_bytes()

    def nbytes(a):
        return int(a.size) * a.dtype.itemsize

    wbuf = 1 if single_buffer_weights else 2

    # ---------------- phase 1: KV / key_sum accumulation -------------------
    kv_w_bytes = nbytes(wkv) + nbytes(bkv)
    vmem1 = (2 * 2 * tile * D * 2              # k, v bf16 input double-buffers
             + wbuf * kv_w_bytes               # fused weights (+bias)
             + 2 * (D * D * 4 + D * 4)         # output buffers
             + D * D * 4 + D * 4               # scratch accumulators
             + 20 * tile * D * 4               # f32 intermediates (generous)
             + (2 << 20))
    vmem1 = int(min(ceiling, max(vmem1, 32 * 1024 * 1024)))

    kv, key_sum = pl.pallas_call(
        functools.partial(_kv_accum_kernel, d_model=D),
        out_shape=(jax.ShapeDtypeStruct((B, D, D), jnp.float32),
                   jax.ShapeDtypeStruct((B, 1, D), jnp.float32)),
        grid_spec=pltpu.PrefetchScalarGridSpec(
            num_scalar_prefetch=0,
            grid=(B, n_tiles),
            in_specs=[
                pl.BlockSpec((1, tile, D), lambda b, t: (b, t, 0)),
                pl.BlockSpec((1, tile, D), lambda b, t: (b, t, 0)),
                _weight_spec(wkv.shape, single_buffer_weights),
                _weight_spec(bkv.shape, single_buffer_weights),
            ],
            out_specs=[
                pl.BlockSpec((1, D, D), lambda b, t: (b, 0, 0)),
                pl.BlockSpec((1, 1, D), lambda b, t: (b, 0, 0)),
            ],
            scratch_shapes=[pltpu.VMEM((D, D), jnp.float32),
                            pltpu.VMEM((1, D), jnp.float32)],
        ),
        compiler_params=pltpu.CompilerParams(
            dimension_semantics=("parallel", "arbitrary"),
            vmem_limit_bytes=vmem1,
        ),
        cost_estimate=pl.CostEstimate(
            flops=int(10 * B * S * D * D),
            transcendentals=int(3 * B * S * D),
            bytes_accessed=int(2 * B * S * D * 2 + kv_w_bytes
                               + B * D * D * 4 + B * D * 4),
        ),
    )(k_b, v_b, wkv, bkv)

    # -------- tiny O(B*D^2) RHS assembly on the host (hoisted head mask) ---
    head_ids = jnp.arange(D) // d_k
    head_mask = (head_ids[:, None] == head_ids[None, :]).astype(jnp.float32)
    ks_col = jnp.swapaxes(key_sum, 1, 2) * (1.0 / float(S))      # (B, D, 1)
    rhs = jnp.concatenate(
        [kv * head_mask[None], ks_col * head_mask[None]], axis=-1
    ).astype(jnp.bfloat16)                                        # (B, D, 2D)

    # ---------------- phase 2: attention + output projection ---------------
    q_w_bytes = nbytes(wq) + nbytes(bq) + nbytes(wo) + nbytes(bo)
    vmem2 = (2 * tile * D * 2                  # query bf16 double-buffer
             + 2 * D * 2 * D * 2               # rhs bf16 double-buffer
             + wbuf * q_w_bytes
             + 2 * tile * D * 4                # output double-buffer
             + 20 * tile * D * 4               # f32 intermediates (generous)
             + (2 << 20))
    vmem2 = int(min(ceiling, max(vmem2, 32 * 1024 * 1024)))

    out = pl.pallas_call(
        functools.partial(_attn_out_kernel, d_model=D,
                          denom_scale=float(S), eps=eps),
        out_shape=jax.ShapeDtypeStruct((B, S, D), jnp.float32),
        grid_spec=pltpu.PrefetchScalarGridSpec(
            num_scalar_prefetch=0,
            grid=(B, n_tiles),
            in_specs=[
                pl.BlockSpec((1, tile, D), lambda b, t: (b, t, 0)),
                pl.BlockSpec((1, D, 2 * D), lambda b, t: (b, 0, 0)),
                _weight_spec(wq.shape, single_buffer_weights),
                _weight_spec(bq.shape, single_buffer_weights),
                _weight_spec(wo.shape, single_buffer_weights),
                _weight_spec(bo.shape, single_buffer_weights),
            ],
            out_specs=pl.BlockSpec((1, tile, D), lambda b, t: (b, t, 0)),
        ),
        compiler_params=pltpu.CompilerParams(
            dimension_semantics=("parallel", "parallel"),
            vmem_limit_bytes=vmem2,
        ),
        cost_estimate=pl.CostEstimate(
            flops=int(10 * B * S * D * D),
            transcendentals=int(3 * B * S * D),
            bytes_accessed=int(B * S * D * 2 + B * D * 2 * D * 2 + q_w_bytes
                               + B * S * D * 4),
        ),
    )(q_b, rhs, wq, bq, wo, bo)

    return out


def multi_head_linear_attention(query, key, value, params, num_heads, *,
                                eps=1e-6, seq_tile=None):
    """Pallas TPU forward of MultiHeadLinearAttention (mask=None path)."""
    B, S, D = query.shape
    assert D % num_heads == 0
    fused = _fuse_params(params)
    try:
        return _mhla_pallas(query, key, value, fused, num_heads, eps,
                            seq_tile, single_buffer_weights=True)
    except Exception:
        # Older Pallas/Mosaic builds may reject pl.Buffered(1) on constant
        # weight specs; retry with default double-buffering.
        return _mhla_pallas(query, key, value, fused, num_heads, eps,
                            seq_tile, single_buffer_weights=False)


# ---------------------------------------------------------------------------
# Pure-JAX reference and test harness.
# ---------------------------------------------------------------------------
def multi_head_linear_attention_ref(query, key, value, params, num_heads):
    """Pure-JAX f32 mirror of the PyTorch forward (mask=None)."""
    B, S, D = query.shape
    d_k = D // num_heads
    p = params

    def lin(x, w, b):
        return x @ w + b

    def gate(x, w1, b1, w2, b2):
        return jax.nn.silu(lin(x, w1, b1)) * lin(x, w2, b2)

    def heads(x):
        return x.reshape(B, S, num_heads, d_k).transpose(0, 2, 1, 3)

    q = heads(gate(query, p["wq1"], p["bq1"], p["wq2"], p["bq2"]))
    k = heads(gate(key, p["wk1"], p["bk1"], p["wk2"], p["bk2"]))
    v = heads(gate(value, p["wv1"], p["bv1"], p["wv2"], p["bv2"]))

    phi_q = jax.nn.elu(q) + 1.0
    phi_k = jax.nn.elu(k) + 1.0
    key_value = jnp.einsum("bhsd,bhse->bhde", phi_k, v)
    key_sum = phi_k.sum(axis=-2)
    q_k_sum = jnp.einsum("bhsd,bhd->bhs", phi_q, key_sum)
    z_inv = 1.0 / (q_k_sum[..., None] + 1e-6)
    attn = jnp.einsum("bhsd,bhde->bhse", phi_q, key_value) * z_inv
    attn = attn.transpose(0, 2, 1, 3).reshape(B, S, D)
    return lin(attn, p["wo"], p["bo"])


def make_params(rng, d_model):
    """Deterministic synthetic parameters. Linear weights stored as (in, out)."""
    ks = jax.random.split(rng, 14)
    s = 0.05

    def w(k, shape):
        return jax.random.normal(k, shape, jnp.float32) * s

    return {
        "wq1": w(ks[0], (d_model, d_model)), "bq1": w(ks[1], (1, d_model)),
        "wq2": w(ks[2], (d_model, d_model)), "bq2": w(ks[3], (1, d_model)),
        "wk1": w(ks[4], (d_model, d_model)), "bk1": w(ks[5], (1, d_model)),
        "wk2": w(ks[6], (d_model, d_model)), "bk2": w(ks[7], (1, d_model)),
        "wv1": w(ks[8], (d_model, d_model)), "bv1": w(ks[9], (1, d_model)),
        "wv2": w(ks[10], (d_model, d_model)), "bv2": w(ks[11], (1, d_model)),
        "wo": w(ks[12], (d_model, d_model)), "bo": w(ks[13], (1, d_model)),
    }


if __name__ == "__main__":
    # Small config consistent with the module (d_model % num_heads == 0).
    # S=16 with seq_tile=8 exercises the multi-tile KV accumulation path.
    B, S, D, H = 2, 16, 32, 4

    root = jax.random.PRNGKey(0)
    kq, kk, kv_key, kp = jax.random.split(root, 4)
    query = jax.random.normal(kq, (B, S, D), jnp.float32)
    key_in = jax.random.normal(kk, (B, S, D), jnp.float32)
    value = jax.random.normal(kv_key, (B, S, D), jnp.float32)
    params = make_params(kp, D)

    out = jax.block_until_ready(
        multi_head_linear_attention(query, key_in, value, params, num_heads=H,
                                    seq_tile=8))
    ref = jax.block_until_ready(
        multi_head_linear_attention_ref(query, key_in, value, params,
                                        num_heads=H))

    assert out.shape == (B, S, D)
    assert jnp.allclose(out, ref, atol=2e-2, rtol=2e-2), "mismatch vs reference"

    print("KERNEL_OK")
</pallas_src>

<mosaic_0001>
module attributes {stable_mosaic.version = 11 : i64} {
  func.func @_kv_accum_kernel(%arg0: i32, %arg1: i32, %arg2: memref<1x8x32xbf16, #tpu.memory_space<vmem>>, %arg3: memref<1x8x32xbf16, #tpu.memory_space<vmem>>, %arg4: memref<2x32x64xbf16, #tpu.memory_space<vmem>>, %arg5: memref<2x1x64xf32, #tpu.memory_space<vmem>>, %arg6: memref<1x32x32xf32, #tpu.memory_space<vmem>>, %arg7: memref<1x1x32xf32, #tpu.memory_space<vmem>>, %arg8: memref<32x32xf32, #tpu.memory_space<vmem>>, %arg9: memref<1x32xf32, #tpu.memory_space<vmem>>) attributes {dimension_semantics = [#tpu.dimension_semantics<parallel>, #tpu.dimension_semantics<arbitrary>], iteration_bounds = array<i64: 2, 2>, scalar_prefetch = 0 : i64, scratch_operands = 2 : i64, tpu.core_type = #tpu.core_type<tc>, window_params = [{transform_indices = @transform_0, window_bounds = array<i64: 1, 8, 32>}, {transform_indices = @transform_1, window_bounds = array<i64: 1, 8, 32>}, {pipeline_mode = #tpu.pipeline_mode<synchronous>, transform_indices = @transform_2, window_bounds = array<i64: 2, 32, 64>}, {pipeline_mode = #tpu.pipeline_mode<synchronous>, transform_indices = @transform_3, window_bounds = array<i64: 2, 1, 64>}, {transform_indices = @transform_4, window_bounds = array<i64: 1, 32, 32>}, {transform_indices = @transform_5, window_bounds = array<i64: 1, 1, 32>}]} {
    %c0_i32 = arith.constant 0 : i32
    %0 = arith.cmpi eq, %arg1, %c0_i32 : i32
    %1 = arith.extui %0 : i1 to i32
    %c0_i32_0 = arith.constant 0 : i32
    %2 = arith.cmpi ne, %1, %c0_i32_0 : i32
    scf.if %2 {
      %cst_33 = arith.constant 0.000000e+00 : f32
      %59 = vector.broadcast %cst_33 : f32 to vector<32x32xf32>
      %c0_34 = arith.constant 0 : index
      %c0_35 = arith.constant 0 : index
      %60 = vector.load %arg8[%c0_34, %c0_35] : memref<32x32xf32, #tpu.memory_space<vmem>>, vector<32x32xf32>
      tpu.vector_store %arg8[%c0_34, %c0_35], %59 {strides = array<i32>} : memref<32x32xf32, #tpu.memory_space<vmem>>, vector<32x32xf32>,
      %cst_36 = arith.constant 0.000000e+00 : f32
      %61 = vector.broadcast %cst_36 : f32 to vector<1x32xf32>
      %c0_37 = arith.constant 0 : index
      %c0_38 = arith.constant 0 : index
      %62 = vector.load %arg9[%c0_37, %c0_38] : memref<1x32xf32, #tpu.memory_space<vmem>>, vector<1x32xf32>
      tpu.vector_store %arg9[%c0_37, %c0_38], %61 {strides = array<i32>} : memref<1x32xf32, #tpu.memory_space<vmem>>, vector<1x32xf32>,
    } else {
    }
    %c0 = arith.constant 0 : index
    %c0_1 = arith.constant 0 : index
    %c0_2 = arith.constant 0 : index
    %3 = vector.load %arg2[%c0, %c0_1, %c0_2] : memref<1x8x32xbf16, #tpu.memory_space<vmem>>, vector<1x8x32xbf16>
    %4 = vector.shape_cast %3 : vector<1x8x32xbf16> to vector<8x32xbf16>
    %c0_3 = arith.constant 0 : index
    %c0_4 = arith.constant 0 : index
    %c0_5 = arith.constant 0 : index
    %5 = vector.load %arg4[%c0_3, %c0_4, %c0_5] : memref<2x32x64xbf16, #tpu.memory_space<vmem>>, vector<1x32x64xbf16>
    %6 = vector.shape_cast %5 : vector<1x32x64xbf16> to vector<32x64xbf16>
    %cst = arith.constant dense<0.000000e+00> : vector<8x64xf32>
    %7 = tpu.matmul %4, %6, %cst {dimension_numbers = #tpu.dot_dimension_numbers<[1], [0], [0], [1], [0, 0, 1, 1], [], []>} : vector<8x32xbf16>, vector<32x64xbf16>, vector<8x64xf32> -> vector<8x64xf32>
    %c0_6 = arith.constant 0 : index
    %c0_7 = arith.constant 0 : index
    %c0_8 = arith.constant 0 : index
    %8 = vector.load %arg5[%c0_6, %c0_7, %c0_8] : memref<2x1x64xf32, #tpu.memory_space<vmem>>, vector<1x1x64xf32>
    %9 = vector.shape_cast %8 : vector<1x1x64xf32> to vector<1x64xf32>
    %10 = vector.broadcast %9 : vector<1x64xf32> to vector<8x64xf32>
    %11 = arith.addf %7, %10 : vector<8x64xf32>
    %12 = vector.extract_strided_slice %11 {offsets = [0, 0], sizes = [8, 32], strides = [1, 1]} : vector<8x64xf32> to vector<8x32xf32>
    %13 = arith.negf %12 : vector<8x32xf32>
    %14 = math.exp %13 : vector<8x32xf32>
    %cst_9 = arith.constant 1.000000e+00 : f32
    %15 = vector.broadcast %cst_9 : f32 to vector<8x32xf32>
    %16 = arith.addf %15, %14 : vector<8x32xf32>
    %17 = arith.divf %15, %16 : vector<8x32xf32>
    %18 = arith.mulf %12, %17 : vector<8x32xf32>
    %19 = vector.extract_strided_slice %11 {offsets = [0, 32], sizes = [8, 32], strides = [1, 1]} : vector<8x64xf32> to vector<8x32xf32>
    %20 = arith.mulf %18, %19 : vector<8x32xf32>
    %c0_10 = arith.constant 0 : index
    %c0_11 = arith.constant 0 : index
    %c0_12 = arith.constant 0 : index
    %21 = vector.load %arg3[%c0_10, %c0_11, %c0_12] : memref<1x8x32xbf16, #tpu.memory_space<vmem>>, vector<1x8x32xbf16>
    %22 = vector.shape_cast %21 : vector<1x8x32xbf16> to vector<8x32xbf16>
    %c1 = arith.constant 1 : index
    %c0_13 = arith.constant 0 : index
    %c0_14 = arith.constant 0 : index
    %23 = vector.load %arg4[%c1, %c0_13, %c0_14] : memref<2x32x64xbf16, #tpu.memory_space<vmem>>, vector<1x32x64xbf16>
    %24 = vector.shape_cast %23 : vector<1x32x64xbf16> to vector<32x64xbf16>
    %cst_15 = arith.constant dense<0.000000e+00> : vector<8x64xf32>
    %25 = tpu.matmul %22, %24, %cst_15 {dimension_numbers = #tpu.dot_dimension_numbers<[1], [0], [0], [1], [0, 0, 1, 1], [], []>} : vector<8x32xbf16>, vector<32x64xbf16>, vector<8x64xf32> -> vector<8x64xf32>
    %c1_16 = arith.constant 1 : index
    %c0_17 = arith.constant 0 : index
    %c0_18 = arith.constant 0 : index
    %26 = vector.load %arg5[%c1_16, %c0_17, %c0_18] : memref<2x1x64xf32, #tpu.memory_space<vmem>>, vector<1x1x64xf32>
    %27 = vector.shape_cast %26 : vector<1x1x64xf32> to vector<1x64xf32>
    %28 = vector.broadcast %27 : vector<1x64xf32> to vector<8x64xf32>
    %29 = arith.addf %25, %28 : vector<8x64xf32>
    %30 = vector.extract_strided_slice %29 {offsets = [0, 0], sizes = [8, 32], strides = [1, 1]} : vector<8x64xf32> to vector<8x32xf32>
    %31 = arith.negf %30 : vector<8x32xf32>
    %32 = math.exp %31 : vector<8x32xf32>
    %cst_19 = arith.constant 1.000000e+00 : f32
    %33 = vector.broadcast %cst_19 : f32 to vector<8x32xf32>
    %34 = arith.addf %33, %32 : vector<8x32xf32>
    %35 = arith.divf %33, %34 : vector<8x32xf32>
    %36 = arith.mulf %30, %35 : vector<8x32xf32>
    %37 = vector.extract_strided_slice %29 {offsets = [0, 32], sizes = [8, 32], strides = [1, 1]} : vector<8x64xf32> to vector<8x32xf32>
    %38 = arith.mulf %36, %37 : vector<8x32xf32>
    %cst_20 = arith.constant 0.000000e+00 : f32
    %39 = vector.broadcast %cst_20 : f32 to vector<8x32xf32>
    %40 = arith.cmpf ogt, %20, %39 : vector<8x32xf32>
    %cst_21 = arith.constant 1.000000e+00 : f32
    %41 = vector.broadcast %cst_21 : f32 to vector<8x32xf32>
    %42 = arith.addf %20, %41 : vector<8x32xf32>
    %43 = math.exp %20 : vector<8x32xf32>
    %44 = arith.select %40, %42, %43 : vector<8x32xi1>, vector<8x32xf32>
    %c0_22 = arith.constant 0 : index
    %c0_23 = arith.constant 0 : index
    %45 = vector.load %arg8[%c0_22, %c0_23] : memref<32x32xf32, #tpu.memory_space<vmem>>, vector<32x32xf32>
    %46 = arith.truncf %44 : vector<8x32xf32> to vector<8x32xbf16>
    %47 = arith.truncf %38 : vector<8x32xf32> to vector<8x32xbf16>
    %cst_24 = arith.constant dense<0.000000e+00> : vector<32x32xf32>
    %48 = tpu.matmul %46, %47, %cst_24 {dimension_numbers = #tpu.dot_dimension_numbers<[0], [0], [1], [1], [0, 1, 1, 1], [], []>} : vector<8x32xbf16>, vector<8x32xbf16>, vector<32x32xf32> -> vector<32x32xf32>
    %49 = arith.addf %45, %48 : vector<32x32xf32>
    %c0_25 = arith.constant 0 : index
    %c0_26 = arith.constant 0 : index
    %50 = vector.load %arg8[%c0_25, %c0_26] : memref<32x32xf32, #tpu.memory_space<vmem>>, vector<32x32xf32>
    tpu.vector_store %arg8[%c0_25, %c0_26], %49 {strides = array<i32>} : memref<32x32xf32, #tpu.memory_space<vmem>>, vector<32x32xf32>,
    %c0_27 = arith.constant 0 : index
    %c0_28 = arith.constant 0 : index
    %51 = vector.load %arg9[%c0_27, %c0_28] : memref<1x32xf32, #tpu.memory_space<vmem>>, vector<1x32xf32>
    %cst_29 = arith.constant dense<0.000000e+00> : vector<32xf32>
    %52 = vector.multi_reduction <add>, %44, %cst_29 [0] : vector<8x32xf32> to vector<32xf32>
    %53 = vector.shape_cast %52 : vector<32xf32> to vector<1x32xf32>
    %54 = arith.addf %51, %53 : vector<1x32xf32>
    %c0_30 = arith.constant 0 : index
    %c0_31 = arith.constant 0 : index
    %55 = vector.load %arg9[%c0_30, %c0_31] : memref<1x32xf32, #tpu.memory_space<vmem>>, vector<1x32xf32>
    tpu.vector_store %arg9[%c0_30, %c0_31], %54 {strides = array<i32>} : memref<1x32xf32, #tpu.memory_space<vmem>>, vector<1x32xf32>,
    %c1_i32 = arith.constant 1 : i32
    %56 = arith.cmpi eq, %arg1, %c1_i32 : i32
    %57 = arith.extui %56 : i1 to i32
    %c0_i32_32 = arith.constant 0 : i32
    %58 = arith.cmpi ne, %57, %c0_i32_32 : i32
    scf.if %58 {
      %c0_33 = arith.constant 0 : index
      %c0_34 = arith.constant 0 : index
      %59 = vector.load %arg8[%c0_33, %c0_34] : memref<32x32xf32, #tpu.memory_space<vmem>>, vector<32x32xf32>
      %c0_35 = arith.constant 0 : index
      %c0_36 = arith.constant 0 : index
      %c0_37 = arith.constant 0 : index
      %60 = vector.load %arg6[%c0_35, %c0_36, %c0_37] : memref<1x32x32xf32, #tpu.memory_space<vmem>>, vector<1x32x32xf32>
      %61 = vector.shape_cast %60 : vector<1x32x32xf32> to vector<32x32xf32>
      %62 = vector.shape_cast %59 : vector<32x32xf32> to vector<1x32x32xf32>
      tpu.vector_store %arg6[%c0_35, %c0_36, %c0_37], %62 {strides = array<i32>} : memref<1x32x32xf32, #tpu.memory_space<vmem>>, vector<1x32x32xf32>,
      %c0_38 = arith.constant 0 : index
      %c0_39 = arith.constant 0 : index
      %63 = vector.load %arg9[%c0_38, %c0_39] : memref<1x32xf32, #tpu.memory_space<vmem>>, vector<1x32xf32>
      %c0_40 = arith.constant 0 : index
      %c0_41 = arith.constant 0 : index
      %c0_42 = arith.constant 0 : index
      %64 = vector.load %arg7[%c0_40, %c0_41, %c0_42] : memref<1x1x32xf32, #tpu.memory_space<vmem>>, vector<1x1x32xf32>
      %65 = vector.shape_cast %64 : vector<1x1x32xf32> to vector<1x32xf32>
      %66 = vector.shape_cast %63 : vector<1x32xf32> to vector<1x1x32xf32>
      tpu.vector_store %arg7[%c0_40, %c0_41, %c0_42], %66 {strides = array<i32>} : memref<1x1x32xf32, #tpu.memory_space<vmem>>, vector<1x1x32xf32>,
    } else {
    }
    return
  }
  func.func @transform_0(%arg0: i32, %arg1: i32) -> (i32, i32, i32) {
    %c0_i32 = arith.constant 0 : i32
    %c0_i32_0 = arith.constant 0 : i32
    return %arg0, %arg1, %c0_i32 : i32, i32, i32
  }
  func.func @transform_1(%arg0: i32, %arg1: i32) -> (i32, i32, i32) {
    %c0_i32 = arith.constant 0 : i32
    %c0_i32_0 = arith.constant 0 : i32
    return %arg0, %arg1, %c0_i32 : i32, i32, i32
  }
  func.func @transform_2(%arg0: i32, %arg1: i32) -> (i32, i32, i32) {
    %c0_i32 = arith.constant 0 : i32
    %c0_i32_0 = arith.constant 0 : i32
    %c0_i32_1 = arith.constant 0 : i32
    %c0_i32_2 = arith.constant 0 : i32
    return %c0_i32, %c0_i32_0, %c0_i32_1 : i32, i32, i32
  }
  func.func @transform_3(%arg0: i32, %arg1: i32) -> (i32, i32, i32) {
    %c0_i32 = arith.constant 0 : i32
    %c0_i32_0 = arith.constant 0 : i32
    %c0_i32_1 = arith.constant 0 : i32
    %c0_i32_2 = arith.constant 0 : i32
    return %c0_i32, %c0_i32_0, %c0_i32_1 : i32, i32, i32
  }
  func.func @transform_4(%arg0: i32, %arg1: i32) -> (i32, i32, i32) {
    %c0_i32 = arith.constant 0 : i32
    %c0_i32_0 = arith.constant 0 : i32
    %c0_i32_1 = arith.constant 0 : i32
    return %arg0, %c0_i32, %c0_i32_0 : i32, i32, i32
  }
  func.func @transform_5(%arg0: i32, %arg1: i32) -> (i32, i32, i32) {
    %c0_i32 = arith.constant 0 : i32
    %c0_i32_0 = arith.constant 0 : i32
    %c0_i32_1 = arith.constant 0 : i32
    return %arg0, %c0_i32, %c0_i32_0 : i32, i32, i32
  }
}

module attributes {stable_mosaic.version = 11 : i64} {
  func.func @_kv_accum_kernel(%arg0: i32, %arg1: i32, %arg2: memref<1x8x32xbf16, #tpu.memory_space<vmem>>, %arg3: memref<1x8x32xbf16, #tpu.memory_space<vmem>>, %arg4: memref<2x32x64xbf16, #tpu.memory_space<vmem>>, %arg5: memref<2x1x64xf32, #tpu.memory_space<vmem>>, %arg6: memref<1x32x32xf32, #tpu.memory_space<vmem>>, %arg7: memref<1x1x32xf32, #tpu.memory_space<vmem>>, %arg8: memref<32x32xf32, #tpu.memory_space<vmem>>, %arg9: memref<1x32xf32, #tpu.memory_space<vmem>>) attributes {dimension_semantics = [#tpu.dimension_semantics<parallel>, #tpu.dimension_semantics<arbitrary>], iteration_bounds = array<i64: 2, 2>, scalar_prefetch = 0 : i64, scratch_operands = 2 : i64, tpu.core_type = #tpu.core_type<tc>, window_params = [{transform_indices = @transform_0, window_bounds = array<i64: 1, 8, 32>}, {transform_indices = @transform_1, window_bounds = array<i64: 1, 8, 32>}, {pipeline_mode = #tpu.pipeline_mode<synchronous>, transform_indices = @transform_2, window_bounds = array<i64: 2, 32, 64>}, {pipeline_mode = #tpu.pipeline_mode<synchronous>, transform_indices = @transform_3, window_bounds = array<i64: 2, 1, 64>}, {transform_indices = @transform_4, window_bounds = array<i64: 1, 32, 32>}, {transform_indices = @transform_5, window_bounds = array<i64: 1, 1, 32>}]} {
    %c0_i32 = arith.constant 0 : i32
    %0 = arith.cmpi eq, %arg1, %c0_i32 : i32
    %1 = arith.extui %0 : i1 to i32
    %c0_i32_0 = arith.constant 0 : i32
    %2 = arith.cmpi ne, %1, %c0_i32_0 : i32
    scf.if %2 {
      %cst_33 = arith.constant 0.000000e+00 : f32
      %59 = vector.broadcast %cst_33 : f32 to vector<32x32xf32>
      %c0_34 = arith.constant 0 : index
      %c0_35 = arith.constant 0 : index
      %60 = vector.load %arg8[%c0_34, %c0_35] : memref<32x32xf32, #tpu.memory_space<vmem>>, vector<32x32xf32>
      tpu.vector_store %arg8[%c0_34, %c0_35], %59 {strides = array<i32>} : memref<32x32xf32, #tpu.memory_space<vmem>>, vector<32x32xf32>,
      %cst_36 = arith.constant 0.000000e+00 : f32
      %61 = vector.broadcast %cst_36 : f32 to vector<1x32xf32>
      %c0_37 = arith.constant 0 : index
      %c0_38 = arith.constant 0 : index
      %62 = vector.load %arg9[%c0_37, %c0_38] : memref<1x32xf32, #tpu.memory_space<vmem>>, vector<1x32xf32>
      tpu.vector_store %arg9[%c0_37, %c0_38], %61 {strides = array<i32>} : memref<1x32xf32, #tpu.memory_space<vmem>>, vector<1x32xf32>,
    } else {
    }
    %c0 = arith.constant 0 : index
    %c0_1 = arith.constant 0 : index
    %c0_2 = arith.constant 0 : index
    %3 = vector.load %arg2[%c0, %c0_1, %c0_2] : memref<1x8x32xbf16, #tpu.memory_space<vmem>>, vector<1x8x32xbf16>
    %4 = vector.shape_cast %3 : vector<1x8x32xbf16> to vector<8x32xbf16>
    %c0_3 = arith.constant 0 : index
    %c0_4 = arith.constant 0 : index
    %c0_5 = arith.constant 0 : index
    %5 = vector.load %arg4[%c0_3, %c0_4, %c0_5] : memref<2x32x64xbf16, #tpu.memory_space<vmem>>, vector<1x32x64xbf16>
    %6 = vector.shape_cast %5 : vector<1x32x64xbf16> to vector<32x64xbf16>
    %cst = arith.constant dense<0.000000e+00> : vector<8x64xf32>
    %7 = tpu.matmul %4, %6, %cst {dimension_numbers = #tpu.dot_dimension_numbers<[1], [0], [0], [1], [0, 0, 1, 1], [], []>} : vector<8x32xbf16>, vector<32x64xbf16>, vector<8x64xf32> -> vector<8x64xf32>
    %c0_6 = arith.constant 0 : index
    %c0_7 = arith.constant 0 : index
    %c0_8 = arith.constant 0 : index
    %8 = vector.load %arg5[%c0_6, %c0_7, %c0_8] : memref<2x1x64xf32, #tpu.memory_space<vmem>>, vector<1x1x64xf32>
    %9 = vector.shape_cast %8 : vector<1x1x64xf32> to vector<1x64xf32>
    %10 = vector.broadcast %9 : vector<1x64xf32> to vector<8x64xf32>
    %11 = arith.addf %7, %10 : vector<8x64xf32>
    %12 = vector.extract_strided_slice %11 {offsets = [0, 0], sizes = [8, 32], strides = [1, 1]} : vector<8x64xf32> to vector<8x32xf32>
    %13 = arith.negf %12 : vector<8x32xf32>
    %14 = math.exp %13 : vector<8x32xf32>
    %cst_9 = arith.constant 1.000000e+00 : f32
    %15 = vector.broadcast %cst_9 : f32 to vector<8x32xf32>
    %16 = arith.addf %15, %14 : vector<8x32xf32>
    %17 = arith.divf %15, %16 : vector<8x32xf32>
    %18 = arith.mulf %12, %17 : vector<8x32xf32>
    %19 = vector.extract_strided_slice %11 {offsets = [0, 32], sizes = [8, 32], strides = [1, 1]} : vector<8x64xf32> to vector<8x32xf32>
    %20 = arith.mulf %18, %19 : vector<8x32xf32>
    %c0_10 = arith.constant 0 : index
    %c0_11 = arith.constant 0 : index
    %c0_12 = arith.constant 0 : index
    %21 = vector.load %arg3[%c0_10, %c0_11, %c0_12] : memref<1x8x32xbf16, #tpu.memory_space<vmem>>, vector<1x8x32xbf16>
    %22 = vector.shape_cast %21 : vector<1x8x32xbf16> to vector<8x32xbf16>
    %c1 = arith.constant 1 : index
    %c0_13 = arith.constant 0 : index
    %c0_14 = arith.constant 0 : index
    %23 = vector.load %arg4[%c1, %c0_13, %c0_14] : memref<2x32x64xbf16, #tpu.memory_space<vmem>>, vector<1x32x64xbf16>
    %24 = vector.shape_cast %23 : vector<1x32x64xbf16> to vector<32x64xbf16>
    %cst_15 = arith.constant dense<0.000000e+00> : vector<8x64xf32>
    %25 = tpu.matmul %22, %24, %cst_15 {dimension_numbers = #tpu.dot_dimension_numbers<[1], [0], [0], [1], [0, 0, 1, 1], [], []>} : vector<8x32xbf16>, vector<32x64xbf16>, vector<8x64xf32> -> vector<8x64xf32>
    %c1_16 = arith.constant 1 : index
    %c0_17 = arith.constant 0 : index
    %c0_18 = arith.constant 0 : index
    %26 = vector.load %arg5[%c1_16, %c0_17, %c0_18] : memref<2x1x64xf32, #tpu.memory_space<vmem>>, vector<1x1x64xf32>
    %27 = vector.shape_cast %26 : vector<1x1x64xf32> to vector<1x64xf32>
    %28 = vector.broadcast %27 : vector<1x64xf32> to vector<8x64xf32>
    %29 = arith.addf %25, %28 : vector<8x64xf32>
    %30 = vector.extract_strided_slice %29 {offsets = [0, 0], sizes = [8, 32], strides = [1, 1]} : vector<8x64xf32> to vector<8x32xf32>
    %31 = arith.negf %30 : vector<8x32xf32>
    %32 = math.exp %31 : vector<8x32xf32>
    %cst_19 = arith.constant 1.000000e+00 : f32
    %33 = vector.broadcast %cst_19 : f32 to vector<8x32xf32>
    %34 = arith.addf %33, %32 : vector<8x32xf32>
    %35 = arith.divf %33, %34 : vector<8x32xf32>
    %36 = arith.mulf %30, %35 : vector<8x32xf32>
    %37 = vector.extract_strided_slice %29 {offsets = [0, 32], sizes = [8, 32], strides = [1, 1]} : vector<8x64xf32> to vector<8x32xf32>
    %38 = arith.mulf %36, %37 : vector<8x32xf32>
    %cst_20 = arith.constant 0.000000e+00 : f32
    %39 = vector.broadcast %cst_20 : f32 to vector<8x32xf32>
    %40 = arith.cmpf ogt, %20, %39 : vector<8x32xf32>
    %cst_21 = arith.constant 1.000000e+00 : f32
    %41 = vector.broadcast %cst_21 : f32 to vector<8x32xf32>
    %42 = arith.addf %20, %41 : vector<8x32xf32>
    %43 = math.exp %20 : vector<8x32xf32>
    %44 = arith.select %40, %42, %43 : vector<8x32xi1>, vector<8x32xf32>
    %c0_22 = arith.constant 0 : index
    %c0_23 = arith.constant 0 : index
    %45 = vector.load %arg8[%c0_22, %c0_23] : memref<32x32xf32, #tpu.memory_space<vmem>>, vector<32x32xf32>
    %46 = arith.truncf %44 : vector<8x32xf32> to vector<8x32xbf16>
    %47 = arith.truncf %38 : vector<8x32xf32> to vector<8x32xbf16>
    %cst_24 = arith.constant dense<0.000000e+00> : vector<32x32xf32>
    %48 = tpu.matmul %46, %47, %cst_24 {dimension_numbers = #tpu.dot_dimension_numbers<[0], [0], [1], [1], [0, 1, 1, 1], [], []>} : vector<8x32xbf16>, vector<8x32xbf16>, vector<32x32xf32> -> vector<32x32xf32>
    %49 = arith.addf %45, %48 : vector<32x32xf32>
    %c0_25 = arith.constant 0 : index
    %c0_26 = arith.constant 0 : index
    %50 = vector.load %arg8[%c0_25, %c0_26] : memref<32x32xf32, #tpu.memory_space<vmem>>, vector<32x32xf32>
    tpu.vector_store %arg8[%c0_25, %c0_26], %49 {strides = array<i32>} : memref<32x32xf32, #tpu.memory_space<vmem>>, vector<32x32xf32>,
    %c0_27 = arith.constant 0 : index
    %c0_28 = arith.constant 0 : index
    %51 = vector.load %arg9[%c0_27, %c0_28] : memref<1x32xf32, #tpu.memory_space<vmem>>, vector<1x32xf32>
    %cst_29 = arith.constant dense<0.000000e+00> : vector<32xf32>
    %52 = vector.multi_reduction <add>, %44, %cst_29 [0] : vector<8x32xf32> to vector<32xf32>
    %53 = vector.shape_cast %52 : vector<32xf32> to vector<1x32xf32>
    %54 = arith.addf %51, %53 : vector<1x32xf32>
    %c0_30 = arith.constant 0 : index
    %c0_31 = arith.constant 0 : index
    %55 = vector.load %arg9[%c0_30, %c0_31] : memref<1x32xf32, #tpu.memory_space<vmem>>, vector<1x32xf32>
    tpu.vector_store %arg9[%c0_30, %c0_31], %54 {strides = array<i32>} : memref<1x32xf32, #tpu.memory_space<vmem>>, vector<1x32xf32>,
    %c1_i32 = arith.constant 1 : i32
    %56 = arith.cmpi eq, %arg1, %c1_i32 : i32
    %57 = arith.extui %56 : i1 to i32
    %c0_i32_32 = arith.constant 0 : i32
    %58 = arith.cmpi ne, %57, %c0_i32_32 : i32
    scf.if %58 {
      %c0_33 = arith.constant 0 : index
      %c0_34 = arith.constant 0 : index
      %59 = vector.load %arg8[%c0_33, %c0_34] : memref<32x32xf32, #tpu.memory_space<vmem>>, vector<32x32xf32>
      %c0_35 = arith.constant 0 : index
      %c0_36 = arith.constant 0 : index
      %c0_37 = arith.constant 0 : index
      %60 = vector.load %arg6[%c0_35, %c0_36, %c0_37] : memref<1x32x32xf32, #tpu.memory_space<vmem>>, vector<1x32x32xf32>
      %61 = vector.shape_cast %60 : vector<1x32x32xf32> to vector<32x32xf32>
      %62 = vector.shape_cast %59 : vector<32x32xf32> to vector<1x32x32xf32>
      tpu.vector_store %arg6[%c0_35, %c0_36, %c0_37], %62 {strides = array<i32>} : memref<1x32x32xf32, #tpu.memory_space<vmem>>, vector<1x32x32xf32>,
      %c0_38 = arith.constant 0 : index
      %c0_39 = arith.constant 0 : index
      %63 = vector.load %arg9[%c0_38, %c0_39] : memref<1x32xf32, #tpu.memory_space<vmem>>, vector<1x32xf32>
      %c0_40 = arith.constant 0 : index
      %c0_41 = arith.constant 0 : index
      %c0_42 = arith.constant 0 : index
      %64 = vector.load %arg7[%c0_40, %c0_41, %c0_42] : memref<1x1x32xf32, #tpu.memory_space<vmem>>, vector<1x1x32xf32>
      %65 = vector.shape_cast %64 : vector<1x1x32xf32> to vector<1x32xf32>
      %66 = vector.shape_cast %63 : vector<1x32xf32> to vector<1x1x32xf32>
      tpu.vector_store %arg7[%c0_40, %c0_41, %c0_42], %66 {strides = array<i32>} : memref<1x1x32xf32, #tpu.memory_space<vmem>>, vector<1x1x32xf32>,
    } else {
    }
    return
  }
  func.func @transform_0(%arg0: i32, %arg1: i32) -> (i32, i32, i32) {
    %c0_i32 = arith.constant 0 : i32
    %c0_i32_0 = arith.constant 0 : i32
    return %arg0, %arg1, %c0_i32 : i32, i32, i32
  }
  func.func @transform_1(%arg0: i32, %arg1: i32) -> (i32, i32, i32) {
    %c0_i32 = arith.constant 0 : i32
    %c0_i32_0 = arith.constant 0 : i32
    return %arg0, %arg1, %c0_i32 : i32, i32, i32
  }
  func.func @transform_2(%arg0: i32, %arg1: i32) -> (i32, i32, i32) {
    %c0_i32 = arith.constant 0 : i32
    %c0_i32_0 = arith.constant 0 : i32
    %c0_i32_1 = arith.constant 0 : i32
    %c0_i32_2 = arith.constant 0 : i32
    return %c0_i32, %c0_i32_0, %c0_i32_1 : i32, i32, i32
  }
  func.func @transform_3(%arg0: i32, %arg1: i32) -> (i32, i32, i32) {
    %c0_i32 = arith.constant 0 : i32
    %c0_i32_0 = arith.constant 0 : i32
    %c0_i32_1 = arith.constant 0 : i32
    %c0_i32_2 = arith.constant 0 : i32
    return %c0_i32, %c0_i32_0, %c0_i32_1 : i32, i32, i32
  }
  func.func @transform_4(%arg0: i32, %arg1: i32) -> (i32, i32, i32) {
    %c0_i32 = arith.constant 0 : i32
    %c0_i32_0 = arith.constant 0 : i32
    %c0_i32_1 = arith.constant 0 : i32
    return %arg0, %c0_i32, %c0_i32_0 : i32, i32, i32
  }
  func.func @transform_5(%arg0: i32, %arg1: i32) -> (i32, i32, i32) {
    %c0_i32 = arith.constant 0 : i32
    %c0_i32_0 = arith.constant 0 : i32
    %c0_i32_1 = arith.constant 0 : i32
    return %arg0, %c0_i32, %c0_i32_0 : i32, i32, i32
  }
}

</mosaic_0001>

<bundles_post_ra>
// kernel: tpu_custom_call.1
= control target key start
LH: loop header
LB: loop body
LE: loop exit
PB: predicated region body
PF: predicated region fallthrough
CT: control target
= control target key end

     0   :  { %s1595_s0 = inlined_call_operand.hbm [shape: bf16[2,16,32], index: 0, kind: input, shape index: {}]   ;;  %s1596_s1 = inlined_call_operand.hbm [shape: bf16[2,16,32], index: 1, kind: input, shape index: {}]   ;;  %s1597_s2 = inlined_call_operand.hbm [shape: bf16[2,32,64], index: 2, kind: input, shape index: {}]   ;;  %s1598_s3 = inlined_call_operand.vmem [shape: f32[2,1,64], index: 3, kind: input, shape index: {}]   ;;  %s1599_s4 = inlined_call_operand.hbm [shape: f32[2,32,32], index: 4, kind: output, shape index: {0}]   ;;  %s1600_s5 = inlined_call_operand.hbm [shape: f32[2,1,32], index: 5, kind: output, shape index: {1}]  }
   0x1   :  { %1612 = sst [smem:[#allocation24_spill]] %s1595_s0 }
   0x2   :  { %1613 = sst [smem:[#allocation25_spill]] %s1596_s1 }
   0x3   :  { %1614 = sst [smem:[#allocation26_spill]] %s1597_s2 }
   0x4   :  { %1615 = sst [smem:[#allocation27_spill]] %s1598_s3 }
   0x5   :  { %1616 = sst [smem:[#allocation28_spill]] %s1599_s4 }
   0x6   :  { %1617 = sst [smem:[#allocation29_spill]] %s1600_s5 }
   0x7   :  { %11 = vsyncpa [#allocation5], 0 }
   0x8   :  { %13 = vsyncpa [#allocation5 + $0x1], 0 }
   0x9   :  { %14 = vsyncpa [#allocation8], 0 }
   0xa   :  { %16 = vsyncpa [#allocation8 + $0x1], 0 }
   0xb   :  { %17 = vsyncpa [#allocation6], 0 }
   0xc   :  { %19 = vsyncpa [#allocation6 + $0x1], 0 }
   0xd   :  { %20 = vsyncpa [#allocation12], 0 }
   0xe   :  { %22 = vsyncpa [#allocation12 + $0x1], 0  ;;  %s1294_s18 = smov 0   ;;  %s1296_s19 = smov 0  }
   0xf   :  { %s1298_s20 = smov 0   ;;  %s1300_s21 = smov 0  }
  0x10   :  { %s1302_s22 = smov 0   ;;  %s1304_s23 = smov 0  }
  0x11   :  { %s1306_s24 = smov 0   ;;  %s1308_s25 = smov 0  }
  0x12   :  { %s1310_s26 = smov 0   ;;  %s1312_s27 = smov 0  }
  0x13   :  { %s1314_s28 = smov 0  }
  0x14 LB: > { %1618 = sst [smem:[#allocation18_spill]] %s1209_s18  ;;  %s1348_s29 = sadd.s32 4294967295, %s1249_s28   ;;  %s1249_s28 = sphi %s1314_s28, %s28_s28   ;;  %s1245_s27 = sphi %s1312_s27, %s1655_s27   ;;  %s1241_s26 = sphi %s1310_s26, %s1654_s26   ;;  %s1237_s25 = sphi %s1308_s25, %s1653_s25   ;;  %s1233_s24 = sphi %s1306_s24, %s1652_s24   ;;  %s1229_s23 = sphi %s1304_s23, %s1651_s23   ;;  %s1225_s22 = sphi %s1302_s22, %s1650_s22   ;;  %s1221_s21 = sphi %s1300_s21, %s1649_s21   ;;  %s1217_s20 = sphi %s1298_s20, %s1648_s20   ;;  %s1213_s19 = sphi %s1296_s19, %s1647_s19   ;;  %s1209_s18 = sphi %s1294_s18, %s1646_s18  }
  0x15   : > { %1619 = sst [smem:[#allocation19_spill]] %s1233_s24  ;;  %s794_s30 = sadd.s32 4294967294, %s1249_s28  }
  0x16   : > { %1620 = sst [smem:[#allocation20_spill]] %s1237_s25  ;;  %p62_p0 = scmp.ne.s32.totalorder %s1225_s22, %s1221_s21 }
  0x17   : > { %p63_p1 = scmp.eq.s32.totalorder %s1348_s29, 0  ;;  %p155_p2 = scmp.ne.s32.totalorder %s1217_s20, %s1213_s19 }
  0x18   : > { %p156_p3 = scmp.eq.s32.totalorder %s1348_s29, 3  ;;  %p161_p5 = scmp.ne.s32.totalorder %s1213_s19, %s1209_s18 }
  0x19   : > { %p1358_p4 = por %p63_p1, %p62_p0  ;;  %p162_p7 = scmp.eq.s32.totalorder %s794_s30, 3 }
  0x1a   : > { %p1364_p6 = por %p156_p3, %p155_p2  ;;  %p795_p8 = scmp.ge.s32.totalorder %s1249_s28, 1 }
  0x1b   : > { %p195_p9 = scmp.lt.s32.totalorder %s1249_s28, 5  ;;  %p1370_p10 = por %p162_p7, %p161_p5 }
  0x1c   : > { %s1622_s7 = scalar_select %p1364_p6, 1, 0 }
  0x1d   : > { %s1624_s8 = scalar_select %p1370_p10, 1, 0 }
  0x1e   : > { %1623 = sst [smem:[#allocation21_spill]] %s1622_s7  ;;  %p1374_p11 = pnand %p795_p8, %p195_p9 }
  0x1f   : > { %1625 = sst [smem:[#allocation22_spill]] %s1624_s8  ;;  %s1251_s10 = smov [#allocation9]  }
  0x20   : > { %s207_s11 = sshll.u32 %s1251_s10, 4  ;;  %p875_p12 = pneg %p1374_p11  ;;  %s208_s11 = int_to_ptr.vmem [resolvable:$true] %s207_s11 }
  0x21   : > { %s1020_s12 = scalar_lea.vmem %s208_s11, 512  ;;  %p1028_p7 = scmp.lt.s32.totalorder %s208_s11, %s208_s11 }
  0x22   : > { %p876_p13 = pnand %p875_p12, %p63_p1  ;;  %p1021_p2 = scmp.ne.s32.totalorder %s208_s11, %s1020_s12 }
  0x23   : > { %p1029_p6 = scmp.lt.s32.totalorder %s1020_s12, %s1020_s12 }
  0x24   : > { %p1011_p0 = pneg %p876_p13 }
  0x25   : > { %p1030_p10 = por %p1029_p6, %p1028_p7 }
  0x26   : > { %p1023_p3 = pnand %p1021_p2, %p1011_p0 }
  0x28   : > { %p1024_p5 = pneg %p1023_p3 }
  0x2a   : > { %p1031_p8 = pnand %p1030_p10, %p1024_p5 }
  0x2c   : > { %1034 = shalt.err (!%p1031_p8)
}
  0x2d   : > { %s1252_s13 = smov 64   ;;  %s1253_s14 = smov 4  }
  0x2e   : > { %s1627_s2 = sld [smem:[#allocation26_spill]]  ;;  %s37_s17 = sadd.s32 1, %s1241_s26 }
  0x2f   : > { %s40_s21 = sadd.s32 1, %s1245_s27  ;;  %p38_p6 = scmp.ge.s32.totalorder %s37_s17, 2 }
  0x30   : > { %s49_s30 = sadd.s32 1, %s1229_s23  ;;  %p56_p9 = scmp.ne.s32.totalorder %s1229_s23, %s1225_s22 }
  0x31   : > { %p57_p10 = scmp.eq.s32.totalorder %s1249_s28, 0  ;;  %s1657_s17 = smov (%p38_p6, %s37_s17), 0 }
  0x32   : > { %1628 = sst [smem:[#allocation23_spill]] %s1657_s17  ;;  %s1659_s21 = smov (!%p38_p6, %s40_s21), %s1245_s27 }
  0x33   : > { %s45_s10 = ssub.s32 %s1241_s26, %s1657_s17  ;;  %p1396_p12 = por %p57_p10, %p56_p9 }
  0x34   : > { %878 = dma.hbm_to_vmem [thread:$0]  (!%p876_p13), %s1627_s2, 512, %s208_s11, [#allocation8], %s1252_s13, %s1252_s13, %s1253_s14  }
  0x35   : > { %p42_p13 = scmp.ge.s32.totalorder %s1659_s21, 2  ;;  %s145_s11 = sadd.s32 1, %s1217_s20 }
  0x36   : > { %p894_p0 = scmp.lt.s32.totalorder %s1249_s28, 4  ;;  %s224_s13 = sand.u32 1, %s1229_s23  }
  0x37   : > { %s1661_s21 = smov (%p42_p13, %s1659_s21), 0  ;;  %s1405_s14 = sshll.u32 %s224_s13, 2 }
  0x38   : > { %s44_s15 = ssub.s32 %s1245_s27, %s1661_s21  ;;  %s799_s2 = sshll.u32 %s1245_s27, 1 }
  0x39   : > { %s46_s16 = sor.u32 %s45_s10, %s44_s15  ;;  %p143_p2 = scmp.eq.s32.totalorder %s44_s15, 0 }
  0x3a   : > { %p47_p3 = scmp.eq.s32.totalorder %s46_s16, 0  ;;  %s233_s18 = sadd.s32 %s1241_s26, %s799_s2 }
  0x3b   : > { %s1411_s17 = scalar_select %p143_p2, %s1217_s20, %s145_s11  }
  0x3c   : > { %s1414_s8 = scalar_select %p47_p3, %s1229_s23, %s49_s30  }
  0x3d   : > { %s228_s5 = scalar_lea.vmem [#allocation4], %s1405_s14  ;;  %s800_s7 = sshll.u32 %s233_s18, 6 }
  0x3e   : > { %s237_s4 = sshll.u32 %s228_s5, 4  ;;  %s1630_s0 = sld [smem:[#allocation24_spill]]  ;;  %s238_s4 = int_to_ptr.vmem [resolvable:$true] %s237_s4 }
  0x3f   : > { %p1425_p5 = pnand %p894_p0, %p1396_p12  ;;  %s1632_s1 = sld [smem:[#allocation25_spill]] }
  0x40   : > { %s244_s5 = sand.u32 1, %s1249_s28   ;;  %s225_s18 = scalar_lea.sflag [#allocation5], %s224_s13 }
  0x41   : > { %p1037_p7 = pneg %p1425_p5  ;;  %s1048_s30 = scalar_lea.vmem %s238_s4, 64 }
  0x42   : > { %p1049_p8 = scmp.ne.s32.totalorder %s238_s4, %s1048_s30  ;;  %s1254_s3 = smov [#allocation4]  }
  0x43   : > { %s1053_s25 = sshll.u32 %s1254_s3, 4  ;;  %s1054_s25 = int_to_ptr.vmem [resolvable:$false] %s1053_s25 }
  0x44   : > { %s235_s24 = scalar_lea.hbm %s1630_s0, %s800_s7  ;;  %p1051_p6 = pnand %p1049_p8, %p1037_p7 }
  0x45   : > { %s1432_s2 = scalar_lea.hbm %s1632_s1, %s800_s7  ;;  %s1055_s12 = scalar_lea.vmem %s1054_s25, 128 }
  0x46   : > { %p1052_p9 = pneg %p1051_p6  ;;  %p1056_p10 = scmp.lt.s32.totalorder %s238_s4, %s1054_s25 }
  0x47   : > { %p1057_p12 = scmp.lt.s32.totalorder %s1055_s12, %s1048_s30 }
  0x49   : > { %p1058_p13 = por %p1057_p12, %p1056_p10 }
  0x4b   : > { %p1059_p0 = pnand %p1058_p13, %p1052_p9 }
  0x4d   : > { %1062 = shalt.err (!%p1059_p0)
}
  0x4e   : > { %882 = dma.hbm_to_vmem [thread:$0]  (!%p1425_p5), %s235_s24, 64, %s238_s4, %s225_s18  }
  0x4f   : > { %s248_s7 = scalar_lea.vmem [#allocation7], %s1405_s14  ;;  %s245_s16 = scalar_lea.sflag [#allocation8], %s244_s5 }
  0x50   : > { %s257_s13 = sshll.u32 %s248_s7, 4  ;;  %s1255_s11 = smov [#allocation7]   ;;  %s258_s13 = int_to_ptr.vmem [resolvable:$true] %s257_s13 }
  0x51   : > { %s1076_s15 = scalar_lea.vmem %s258_s13, 64  ;;  %s1081_s30 = sshll.u32 %s1255_s11, 4  ;;  %s1082_s30 = int_to_ptr.vmem [resolvable:$false] %s1081_s30 }
  0x52   : > { %p1077_p2 = scmp.ne.s32.totalorder %s258_s13, %s1076_s15  ;;  %s1083_s3 = scalar_lea.vmem %s1082_s30, 128 }
  0x53   : > { %p1084_p6 = scmp.lt.s32.totalorder %s258_s13, %s1082_s30  ;;  %p1085_p9 = scmp.lt.s32.totalorder %s1083_s3, %s1076_s15 }
  0x54   : > { %p1079_p3 = pnand %p1077_p2, %p1037_p7 }
  0x55   : > { %p1086_p10 = por %p1085_p9, %p1084_p6 }
  0x56   : > { %p1080_p8 = pneg %p1079_p3 }
  0x58   : > { %p1087_p12 = pnand %p1086_p10, %p1080_p8 }
  0x5a   : > { %1090 = shalt.err (!%p1087_p12)
}
  0x5b   : > { %885 = dma.hbm_to_vmem [thread:$0]  (!%p1425_p5), %s1432_s2, 64, %s258_s13, %s245_s16  }
  0x5c   : > { %266 = sbr.rel (%p1374_p11) target bundleno = 825 (0x339), region = 36  ;;  %s268_s4 = sand.u32 (!%p1374_p11), 1, %s1225_s22  }
  0x5d   : > { %s1452_s24 = sshll.u32 (!%p1374_p11), %s268_s4, 2  ;;  %s269_s14 = scalar_lea.sflag (!%p1374_p11), [#allocation5], %s268_s4 }
  0x5e   : > { %s272_s5 = scalar_lea.vmem (!%p1374_p11), [#allocation4], %s1452_s24 }
  0x61   : > { %1188 = dma.done.wait (%p1358_p4), %s269_s14, 64  }
  0x62   : > { %1190 = vsyncadd (%p1358_p4), %s269_s14, 4294967232  ;;  %s277_s10 = sand.u32 1, %s1348_s29   ;;  %s281_s9 = scalar_lea.vmem [#allocation7], %s1452_s24 }
  0x63   : > { %s278_s2 = scalar_lea.sflag [#allocation8], %s277_s10 }
  0x64   : > { %1192 = dma.done.wait (%p1358_p4), %s278_s2, 64  }
  0x65   : > { %1194 = vsyncadd (%p1358_p4), %s278_s2, 4294967232 }
  0x66   : > { %1196 = dma.done.wait (%p63_p1), [#allocation8], 512  }
  0x67   : > { %1198 = vsyncadd (%p63_p1), [#allocation8], 4294966784  ;;  %s1470_s18 = sand.u32 1, %s1213_s19   ;;  %s1633_s13 = sld [smem:[#allocation19_spill]] }
  0x68   : > { %s808_s25 = sshll.u32 %s1470_s18, 5  ;;  %s320_s7 = scalar_lea.vmem [#allocation11], %s1470_s18 }
  0x69   : > { %s1473_s12 = scalar_lea.vmem [#allocation10], %s808_s25 }
  0x6d   : > { %p809_p11 = scmp.ne.s32.totalorder %s1633_s13, 0 }
  0x6f   : > { %325 = sbr.rel (%p809_p11) target bundleno = 120 (0x78), region = 52 }
  0x74   : > { %vm326_vm0 = vcmask 261120   ;;  %vm331_vm1 = vcmask 253952   ;;  %v1256_v0 = vmov 0.0  }
  0x75   : > { %327 = vst.msk [vmem:[#allocation2] sm:$0xff] %vm326_vm0, %v1256_v0  ;;  %328 = vst.msk [vmem:[#allocation2 + $0x8] sm:$0xff] %vm326_vm0, %v1256_v0 }
  0x76   : > { %329 = vst.msk [vmem:[#allocation2 + $0x10] sm:$0xff] %vm326_vm0, %v1256_v0  ;;  %330 = vst.msk [vmem:[#allocation2 + $0x18] sm:$0xff] %vm326_vm0, %v1256_v0 }
  0x77   : > { %332 = vst.msk [vmem:[#allocation3] sm:$0x1] %vm331_vm1, %v1256_v0 }
  0x78 PF: > { %v995_v1 = vld [vmem:[#allocation9 + $0x8] sm:$0xff]   ;;  %v1257_v2 = vmov 0.0   ;;  %v996_v3 = vld [vmem:[#allocation9] sm:$0xff]   ;;  %v997_v4 = vld [vmem:[#allocation9 + $0x18] sm:$0xff]   ;;  %vm1258_vm2 = vmmov 0   ;;  %vm357_vm3 = vcmask 261120  }
  0x79   : > { %840 = vmatprep.subr.bf16.mxu0 %v1257_v2  ;;  %848 = vmatprep.subr.bf16.mxu1 %v1257_v2  ;;  %v998_v5 = vld [vmem:[#allocation9 + $0x10] sm:$0xff]   ;;  %v413_v7 = vld [vmem:[%s281_s9] sm:$0xf]  ;;  %s1634_s16 = sld [smem:[#allocation27_spill]]  ;;  %s1259_s30 = smov 96   ;;  %vm528_vm4 = vcmask 1043456  }
  0x7a   : > { %841 = vmatpush3.bf16.msra.mxu0 %v995_v1  ;;  %844 = vmatprep.mubr.msk.bf16.mxu0 %vm1258_vm2, %v1257_v2  ;;  %v333_v6 = vld [vmem:[%s272_s5] sm:$0xf]  ;;  %vm598_vm6 = vcmask 253952   ;;  %vm521_vm7 = vcmask 64512   ;;  %s1635_s3 = sld [smem:[#allocation19_spill]] }
  0x7b   : > { %842 = vmatprep.subr.bf16.mxu0 %v1257_v2  ;;  %852 = vmatprep.mubr.msk.bf16.mxu1 %vm1258_vm2, %v1257_v2 }
  0x7c   : > { %849 = vmatpush3.bf16.msra.mxu1 %v997_v4  ;;  %v499_v54 = vld [vmem:[#allocation2] sm:$0xff]  ;;  %v500_v60 = vld [vmem:[#allocation2 + $0x8] sm:$0xff] }
  0x7d   : > { %850 = vmatprep.subr.bf16.mxu1 %v1257_v2  ;;  %v501_v52 = vld [vmem:[#allocation2 + $0x10] sm:$0xff]  ;;  %v502_v57 = vld [vmem:[#allocation2 + $0x18] sm:$0xff] }
  0x7e   : > { %843 = vmatpush3.bf16.msra.mxu0 %v996_v3  ;;  %v589_v47 = vld [vmem:[#allocation3] sm:$0x1] }
  0x7f   : > { %v810_v8 = vld [vmem:[%s1634_s16] ss:$0 sm:$0xff]  ;;  %v816_v10 = vld [vmem:[%s1634_s16 + $0x1] ss:$0 sm:$0xff] }
  0x80   : > { %851 = vmatpush3.bf16.msra.mxu1 %v998_v5  ;;  %p823_p1 = scmp.ne.s32.totalorder %s1635_s3, 1 }
  0x81   : > { %845 = vmatmul.mubr.msk.bf16.vlgmr.msra.gmra.mxu0 %vm357_vm3, %v333_v6 }
  0x83   : > { %853 = vmatmul.mubr.msk.bf16.vlgmr.msra.gmra.mxu1 %vm357_vm3, %v413_v7 }
 0x141   : > { %v395_v9 = vpop.f32.mrf.mxu0 }
 0x142   : > { %v396_v11 = vadd.f32 %v810_v8, %v395_v9 }
 0x143   : > { %v846_v12 = vpop.f32.mrf.mxu0  ;;  %v476_v13 = vpop.f32.mrf.mxu1 }
 0x144   : > { %409 = vrot.lane.b32.xlu0 %v396_v11, %s1259_s30  ;;  %v477_v14 = vadd.f32 %v816_v10, %v476_v13  ;;  %v814_v20 = vmul.f32 -1.442695, %v396_v11 }
 0x145   : > { %v398_v15 = vpop.f32.mrf.mxu0  ;;  %v854_v16 = vpop.f32.mrf.mxu1 }
 0x146   : > { %v820_v21 = vmul.f32 -1.442695, %v477_v14  ;;  %999 = vpow2.f32 %v814_v20 }
 0x147   : > { %v847_v17 = vpop.f32.mrf.mxu0  ;;  %v479_v18 = vpop.f32.mrf.mxu1 }
 0x148   : > { %490 = vrot.lane.b32.xlu0 %v477_v14, %s1259_s30  ;;  %1001 = vpow2.f32 %v820_v21 }
 0x149   : > { %v855_v19 = vpop.f32.mrf.mxu1 }
 0x153   : > { %v1000_v22 = vpop.eup %999 }
 0x154   : > { %v404_v24 = vadd.f32 1.0, %v1000_v22 }
 0x155   : > { %v1002_v23 = vpop.eup %1001 }
 0x156   : > { %v485_v25 = vadd.f32 1.0, %v1002_v23  ;;  %1003 = vrcp.f32 %v404_v24 }
 0x158   : > { %1005 = vrcp.f32 %v485_v25 }
 0x163   : > { %v1004_v26 = vpop.eup %1003 }
 0x164   : > { %v407_v28 = vmul.f32 %v1004_v26, %v396_v11 }
 0x165   : > { %v1006_v27 = vpop.eup %1005 }
 0x166   : > { %v488_v31 = vmul.f32 %v1006_v27, %v477_v14 }
 0x1b6   : > { %v410_v29 = vpop.permute.xlu0 %409 }
 0x1b7   : > { %v412_v30 = vmul.f32 %v410_v29, %v407_v28 }
 0x1b9   : > { %v496_v32 = vmul.f32 1.442695, %v412_v30  ;;  %v495_v37 = vadd.f32 1.0, %v412_v30  ;;  %vm494_vm5 = vcmp.gt.f32.partialorder %v412_v30, 0.0 }
 0x1ba   : > { %v491_v33 = vpop.permute.xlu0 %490 }
 0x1bb   : > { %1007 = vpow2.f32 %v496_v32  ;;  %v493_v34 = vmul.f32 %v491_v33, %v488_v31 }
 0x1bd   : > { %v504_v35 = vpack.c.bf16 %v493_v34, %v493_v34 }
 0x1bf   : > { %v530_v36 = vsel %vm528_vm4, %v504_v35, 0  ;;  %862 = vmatprep.subr.msk.bf16.mxu0 %vm528_vm4, %v504_v35 }
 0x1c0   : > { %857 = vmatpush3.bf16.msra.mxu0 %v530_v36 }
 0x1c8   : > { %v1008_v38 = vpop.eup %1007 }
 0x1c9   : > { %v498_v39 = vsel %vm494_vm5, %v495_v37, %v1008_v38 }
 0x1ca   : > { %v503_v40 = vpack.c.bf16 %v498_v39, %v498_v39  ;;  %v590_v41 = vsel %vm357_vm3, %v498_v39, 0.0 }
 0x1cb   : > { %v591_v42 = vrot.slane %v590_v41, 4 }
 0x1cc   : > { %505 = vxpose.xlu1.c.b16.start.end [1/1] (short) (narrow) %v503_v40, 32 }
 0x1cd   : > { %v592_v43 = vadd.f32 %v591_v42, %v590_v41 }
 0x1cf   : > { %v593_v44 = vrot.slane %v592_v43, 2 }
 0x1d1   : > { %v594_v45 = vadd.f32 %v593_v44, %v592_v43 }
 0x1d3   : > { %v595_v46 = vrot.slane %v594_v45, 1 }
 0x1d5   : > { %v596_v48 = vadd.f32 %v595_v46, %v594_v45 }
 0x1d7   : > { %v597_v49 = vadd.f32 %v596_v48, %v589_v47 }
 0x1d9   : > { %599 = vst.msk [vmem:[#allocation3] sm:$0x1] %vm598_vm6, %v597_v49 }
 0x22e   : > { %v513_v50 = vpop.trf.xlu1 }
 0x22f   : > { %858 = vmatprep.mubr.msk.bf16.mxu0 %vm521_vm7, %v513_v50 }
 0x232   : > { %v514_v51 = vpop.trf.xlu1 }
 0x233   : > { %859 = vmatmul.mubr.msk.bf16.vlgmr.msra.gmra.mxu0 %vm521_vm7, %v514_v51 }
 0x2f3   : > { %v860_v53 = vpop.f32.mrf.mxu0 }
 0x2f4   : > { %v583_v55 = vadd.f32 %v860_v53, %v501_v52 }
 0x2f5   : > { %v566_v56 = vpop.f32.mrf.mxu0 }
 0x2f6   : > { %587 = vst.msk [vmem:[#allocation2 + $0x10] sm:$0xff] %vm357_vm3, %v583_v55  ;;  %v581_v58 = vadd.f32 %v566_v56, %v499_v54 }
 0x2f7   : > { %v861_v59 = vpop.f32.mrf.mxu0 }
 0x2f8   : > { %585 = vst.msk [vmem:[#allocation2] sm:$0xff] %vm357_vm3, %v581_v58  ;;  %v584_v61 = vadd.f32 %v861_v59, %v502_v57  ;;  %603 = sbr.rel (%p823_p1) target bundleno = 773 (0x305), region = 56 }
 0x2f9   : > { %v569_v62 = vpop.f32.mrf.mxu0 }
 0x2fa   : > { %588 = vst.msk [vmem:[#allocation2 + $0x18] sm:$0xff] %vm357_vm3, %v584_v61  ;;  %v582_v63 = vadd.f32 %v569_v62, %v500_v60 }
 0x2fc   : > { %586 = vst.msk [vmem:[#allocation2 + $0x8] sm:$0xff] %vm357_vm3, %v582_v63 }
 0x2fd   : > { %v606_v2 = vld [vmem:[#allocation2 + $0x10] sm:$0xff]  ;;  %v612_v4 = vld [vmem:[#allocation3] sm:$0x1] }
 0x2fe   : > { %610 = vst.msk [vmem:[%s1473_s12 + $0x10] sm:$0xff] %vm357_vm3, %v606_v2 }
 0x2ff   : > { %v604_v0 = vld [vmem:[#allocation2] sm:$0xff]  ;;  %613 = vst.msk [vmem:[%s320_s7] sm:$0x1] %vm598_vm6, %v612_v4 }
 0x300   : > { %608 = vst.msk [vmem:[%s1473_s12] sm:$0xff] %vm357_vm3, %v604_v0 }
 0x301   : > { %v607_v3 = vld [vmem:[#allocation2 + $0x18] sm:$0xff] }
 0x302   : > { %611 = vst.msk [vmem:[%s1473_s12 + $0x18] sm:$0xff] %vm357_vm3, %v607_v3 }
 0x303   : > { %v605_v1 = vld [vmem:[#allocation2 + $0x8] sm:$0xff] }
 0x304   : > { %609 = vst.msk [vmem:[%s1473_s12 + $0x8] sm:$0xff] %vm357_vm3, %v605_v1 }
 0x305 PF: > { %s1636_s4 = sld [smem:[#allocation20_spill]]  ;;  %s632_s25 = sshll.u32 %s1473_s12, 4  ;;  %s1514_s25 = int_to_ptr.vmem [resolvable:$true] %s632_s25 }
 0x306   : > { %s1637_s24 = sld [smem:[#allocation21_spill]]  ;;  %s615_s13 = scalar_lea.sflag [#allocation6], %s1470_s18 }
 0x307   : > { %s1638_s2 = sld [smem:[#allocation28_spill]]  ;;  %s1091_s29 = scalar_lea.vmem %s1514_s25, 512 }
 0x308   : > { %p1092_p4 = scmp.ne.s32.totalorder %s1514_s25, %s1091_s29  ;;  %s1260_s6 = smov [#allocation10]  }
 0x309   : > { %s1095_s15 = sshll.u32 %s1260_s6, 4  ;;  %s1096_s15 = int_to_ptr.vmem [resolvable:$false] %s1095_s15 }
 0x30a   : > { %s1097_s11 = scalar_lea.vmem %s1096_s15, 1024  ;;  %p1098_p0 = scmp.lt.s32.totalorder %s1514_s25, %s1096_s15 }
 0x30b   : > { %s830_s14 = sshll.u32 %s1636_s4, 9  ;;  %p1099_p2 = scmp.lt.s32.totalorder %s1097_s11, %s1091_s29 }
 0x30c   : > { %p1639_p5 = scmp.ne.s32.totalorder %s1637_s24, 0 }
 0x30d   : > { %s1511_s9 = scalar_lea.hbm %s1638_s2, %s830_s14  ;;  %p1100_p3 = por %p1099_p2, %p1098_p0 }
 0x30e   : > { %p1093_p7 = pnand %p1092_p4, %p1639_p5 }
 0x310   : > { %p1094_p13 = pneg %p1093_p7 }
 0x312   : > { %p1101_p8 = pnand %p1100_p3, %p1094_p13 }
 0x314   : > { %1104 = shalt.err (!%p1101_p8)
}
 0x315   : > { %s1105_s12 = scalar_lea.hbm %s1511_s9, 512  ;;  %s1109_s14 = scalar_lea.hbm %s1638_s2, 1024 }
 0x316   : > { %p1106_p6 = scmp.ne.s32.totalorder %s1511_s9, %s1105_s12  ;;  %p1110_p12 = scmp.lt.s32.totalorder %s1511_s9, %s1638_s2 }
 0x317   : > { %p1111_p11 = scmp.lt.s32.totalorder %s1109_s14, %s1105_s12 }
 0x318   : > { %p1107_p9 = pnand %p1106_p6, %p1639_p5 }
 0x319   : > { %p1112_p1 = por %p1111_p11, %p1110_p12 }
 0x31a   : > { %p1108_p10 = pneg %p1107_p9 }
 0x31c   : > { %p1113_p4 = pnand %p1112_p1, %p1108_p10 }
 0x31e   : > { %1116 = shalt.err (!%p1113_p4)
}
 0x31f   : > { %s1261_s29 = smov 128   ;;  %s1262_s6 = smov 8  }
 0x320   : > { %871 = dma.vmem_to_hbm [thread:$0]  (%p1639_p5), %s1514_s25, 512, %s1511_s9, %s615_s13, %s1261_s29, %s1261_s29, %s1262_s6  }
 0x321   : > { %s827_s15 = sshll.u32 %s1636_s4, 4  ;;  %s648_s11 = sshll.u32 %s320_s7, 4  ;;  %s649_s11 = int_to_ptr.vmem [resolvable:$true] %s648_s11 }
 0x322   : > { %s1640_s3 = sld [smem:[#allocation29_spill]]  ;;  %s620_s5 = scalar_lea.sflag [#allocation12], %s1470_s18 }
 0x323   : > { %s1117_s10 = scalar_lea.vmem %s649_s11, 16  ;;  %s1263_s0 = smov [#allocation11]  }
 0x324   : > { %p1118_p7 = scmp.ne.s32.totalorder %s649_s11, %s1117_s10  ;;  %s1121_s1 = sshll.u32 %s1263_s0, 4  ;;  %s1122_s1 = int_to_ptr.vmem [resolvable:$false] %s1121_s1 }
 0x325   : > { %s1123_s2 = scalar_lea.vmem %s1122_s1, 32  ;;  %p1124_p2 = scmp.lt.s32.totalorder %s649_s11, %s1122_s1 }
 0x326   : > { %p1119_p13 = pnand %p1118_p7, %p1639_p5  ;;  %p1125_p3 = scmp.lt.s32.totalorder %s1123_s2, %s1117_s10 }
 0x328   : > { %s646_s14 = scalar_lea.hbm %s1640_s3, %s827_s15  ;;  %p1120_p0 = pneg %p1119_p13 }
 0x329   : > { %p1126_p8 = por %p1125_p3, %p1124_p2 }
 0x32b   : > { %p1127_p6 = pnand %p1126_p8, %p1120_p0 }
 0x32d   : > { %1130 = shalt.err (!%p1127_p6)
}
 0x32e   : > { %s1131_s7 = scalar_lea.hbm %s646_s14, 16  ;;  %s1135_s9 = scalar_lea.hbm %s1640_s3, 32 }
 0x32f   : > { %p1132_p9 = scmp.ne.s32.totalorder %s646_s14, %s1131_s7  ;;  %p1136_p11 = scmp.lt.s32.totalorder %s646_s14, %s1640_s3 }
 0x330   : > { %p1137_p1 = scmp.lt.s32.totalorder %s1135_s9, %s1131_s7 }
 0x331   : > { %p1133_p10 = pnand %p1132_p9, %p1639_p5 }
 0x332   : > { %p1138_p4 = por %p1137_p1, %p1136_p11 }
 0x333   : > { %p1134_p12 = pneg %p1133_p10 }
 0x335   : > { %p1139_p7 = pnand %p1138_p4, %p1134_p12 }
 0x337   : > { %1142 = shalt.err (!%p1139_p7)
}
 0x338   : > { %872 = dma.vmem_to_hbm [thread:$0]  (%p1639_p5), %s649_s11, 16, %s646_s14, %s620_s5  }
 0x339 PF: > { %s1641_s0 = sld [smem:[#allocation18_spill]]  ;;  %p896_p13 = scmp.ge.s32.totalorder %s1249_s28, 2 }
 0x33a   : > { %s1642_s1 = sld [smem:[#allocation22_spill]] }
 0x33f   : > { %s660_s2 = sand.u32 1, %s1641_s0  }
 0x340   : > { %p1643_p0 = scmp.ne.s32.totalorder %s1642_s1, 0  ;;  %s661_s29 = scalar_lea.sflag [#allocation6], %s660_s2 }
 0x342   : > { %p887_p2 = pnand %p896_p13, %p1643_p0 }
 0x344   : > { %p888_p3 = pneg %p887_p2 }
 0x346   : > { %1200 = dma.done.wait (%p888_p3), %s661_s29, 512  }
 0x347   : > { %1202 = vsyncadd (%p888_p3), %s661_s29, 4294966784  ;;  %s670_s6 = scalar_lea.sflag [#allocation12], %s660_s2 }
 0x348   : > { %1204 = dma.done.wait (%p888_p3), %s670_s6, 16  }
 0x349   : > { %1206 = vsyncadd (%p888_p3), %s670_s6, 4294967280  ;;  %s28_s28 = sadd.s32 1, %s1249_s28   ;;  %s1644_s15 = sld [smem:[#allocation23_spill]] }
 0x34a   : > { %p25_p8 = scmp.ge.s32.totalorder %s28_s28, 6   ;;  %s1645_s11 = smov %s1661_s21 }
 0x34b   : > { %s1646_s18 = smov %s1213_s19  ;;  %s1647_s19 = smov %s1217_s20 }
 0x34c   : > { %s1648_s20 = smov %s1411_s17  ;;  %s1649_s21 = smov %s1225_s22 }
 0x34d   : > { %s1650_s22 = smov %s1229_s23  ;;  %s1651_s23 = smov %s1414_s8 }
 0x34e   : > { %s1652_s24 = smov %s1241_s26  ;;  %s1653_s25 = smov %s1245_s27 }
 0x34f   : > { %s1654_s26 = smov %s1644_s15  ;;  %s1655_s27 = smov %s1645_s11 }
 0x350   :  { %27 = sbr.rel (!%p25_p8) target bundleno = 20 (0x14), region = 125 }
 0x355   :  { %674 = vsyncpa [#allocation5], 1 }
 0x356   :  { %676 = vsyncpa [#allocation5 + $0x1], 1 }
 0x357   :  { %677 = vsyncpa [#allocation8], 1 }
 0x358   :  { %679 = vsyncpa [#allocation8 + $0x1], 1 }
 0x359   :  { %680 = vsyncpa [#allocation6], 1 }
 0x35a   :  { %682 = vsyncpa [#allocation6 + $0x1], 1 }
 0x35b   :  { %683 = vsyncpa [#allocation12], 1 }
 0x35c   :  { %685 = vsyncpa [#allocation12 + $0x1], 1 }

// kernel: tpu_custom_call.1
= control target key start
LH: loop header
LB: loop body
LE: loop exit
PB: predicated region body
PF: predicated region fallthrough
CT: control target
= control target key end

     0   :  { %s1595_s0 = inlined_call_operand.hbm [shape: bf16[2,16,32], index: 0, kind: input, shape index: {}]   ;;  %s1596_s1 = inlined_call_operand.hbm [shape: bf16[2,16,32], index: 1, kind: input, shape index: {}]   ;;  %s1597_s2 = inlined_call_operand.hbm [shape: bf16[2,32,64], index: 2, kind: input, shape index: {}]   ;;  %s1598_s3 = inlined_call_operand.vmem [shape: f32[2,1,64], index: 3, kind: input, shape index: {}]   ;;  %s1599_s4 = inlined_call_operand.hbm [shape: f32[2,32,32], index: 4, kind: output, shape index: {0}]   ;;  %s1600_s5 = inlined_call_operand.hbm [shape: f32[2,1,32], index: 5, kind: output, shape index: {1}]  }
   0x1   :  { %1612 = sst [smem:[#allocation24_spill]] %s1595_s0 }
   0x2   :  { %1613 = sst [smem:[#allocation25_spill]] %s1596_s1 }
   0x3   :  { %1614 = sst [smem:[#allocation26_spill]] %s1597_s2 }
   0x4   :  { %1615 = sst [smem:[#allocation27_spill]] %s1598_s3 }
   0x5   :  { %1616 = sst [smem:[#allocation28_spill]] %s1599_s4 }
   0x6   :  { %1617 = sst [smem:[#allocation29_spill]] %s1600_s5 }
   0x7   :  { %11 = vsyncpa [#allocation5], 0 }
   0x8   :  { %13 = vsyncpa [#allocation5 + $0x1], 0 }
   0x9   :  { %14 = vsyncpa [#allocation8], 0 }
   0xa   :  { %16 = vsyncpa [#allocation8 + $0x1], 0 }
   0xb   :  { %17 = vsyncpa [#allocation6], 0 }
   0xc   :  { %19 = vsyncpa [#allocation6 + $0x1], 0 }
   0xd   :  { %20 = vsyncpa [#allocation12], 0 }
   0xe   :  { %22 = vsyncpa [#allocation12 + $0x1], 0  ;;  %s1294_s18 = smov 0   ;;  %s1296_s19 = smov 0  }
   0xf   :  { %s1298_s20 = smov 0   ;;  %s1300_s21 = smov 0  }
  0x10   :  { %s1302_s22 = smov 0   ;;  %s1304_s23 = smov 0  }
  0x11   :  { %s1306_s24 = smov 0   ;;  %s1308_s25 = smov 0  }
  0x12   :  { %s1310_s26 = smov 0   ;;  %s1312_s27 = smov 0  }
  0x13   :  { %s1314_s28 = smov 0  }
  0x14 LB: > { %1618 = sst [smem:[#allocation18_spill]] %s1209_s18  ;;  %s1348_s29 = sadd.s32 4294967295, %s1249_s28   ;;  %s1249_s28 = sphi %s1314_s28, %s28_s28   ;;  %s1245_s27 = sphi %s1312_s27, %s1655_s27   ;;  %s1241_s26 = sphi %s1310_s26, %s1654_s26   ;;  %s1237_s25 = sphi %s1308_s25, %s1653_s25   ;;  %s1233_s24 = sphi %s1306_s24, %s1652_s24   ;;  %s1229_s23 = sphi %s1304_s23, %s1651_s23   ;;  %s1225_s22 = sphi %s1302_s22, %s1650_s22   ;;  %s1221_s21 = sphi %s1300_s21, %s1649_s21   ;;  %s1217_s20 = sphi %s1298_s20, %s1648_s20   ;;  %s1213_s19 = sphi %s1296_s19, %s1647_s19   ;;  %s1209_s18 = sphi %s1294_s18, %s1646_s18  }
  0x15   : > { %1619 = sst [smem:[#allocation19_spill]] %s1233_s24  ;;  %s794_s30 = sadd.s32 4294967294, %s1249_s28  }
  0x16   : > { %1620 = sst [smem:[#allocation20_spill]] %s1237_s25  ;;  %p62_p0 = scmp.ne.s32.totalorder %s1225_s22, %s1221_s21 }
  0x17   : > { %p63_p1 = scmp.eq.s32.totalorder %s1348_s29, 0  ;;  %p155_p2 = scmp.ne.s32.totalorder %s1217_s20, %s1213_s19 }
  0x18   : > { %p156_p3 = scmp.eq.s32.totalorder %s1348_s29, 3  ;;  %p161_p5 = scmp.ne.s32.totalorder %s1213_s19, %s1209_s18 }
  0x19   : > { %p1358_p4 = por %p63_p1, %p62_p0  ;;  %p162_p7 = scmp.eq.s32.totalorder %s794_s30, 3 }
  0x1a   : > { %p1364_p6 = por %p156_p3, %p155_p2  ;;  %p795_p8 = scmp.ge.s32.totalorder %s1249_s28, 1 }
  0x1b   : > { %p195_p9 = scmp.lt.s32.totalorder %s1249_s28, 5  ;;  %p1370_p10 = por %p162_p7, %p161_p5 }
  0x1c   : > { %s1622_s7 = scalar_select %p1364_p6, 1, 0 }
  0x1d   : > { %s1624_s8 = scalar_select %p1370_p10, 1, 0 }
  0x1e   : > { %1623 = sst [smem:[#allocation21_spill]] %s1622_s7  ;;  %p1374_p11 = pnand %p795_p8, %p195_p9 }
  0x1f   : > { %1625 = sst [smem:[#allocation22_spill]] %s1624_s8  ;;  %s1251_s10 = smov [#allocation9]  }
  0x20   : > { %s207_s11 = sshll.u32 %s1251_s10, 4  ;;  %p875_p12 = pneg %p1374_p11  ;;  %s208_s11 = int_to_ptr.vmem [resolvable:$true] %s207_s11 }
  0x21   : > { %s1020_s12 = scalar_lea.vmem %s208_s11, 512  ;;  %p1028_p7 = scmp.lt.s32.totalorder %s208_s11, %s208_s11 }
  0x22   : > { %p876_p13 = pnand %p875_p12, %p63_p1  ;;  %p1021_p2 = scmp.ne.s32.totalorder %s208_s11, %s1020_s12 }
  0x23   : > { %p1029_p6 = scmp.lt.s32.totalorder %s1020_s12, %s1020_s12 }
  0x24   : > { %p1011_p0 = pneg %p876_p13 }
  0x25   : > { %p1030_p10 = por %p1029_p6, %p1028_p7 }
  0x26   : > { %p1023_p3 = pnand %p1021_p2, %p1011_p0 }
  0x28   : > { %p1024_p5 = pneg %p1023_p3 }
  0x2a   : > { %p1031_p8 = pnand %p1030_p10, %p1024_p5 }
  0x2c   : > { %1034 = shalt.err (!%p1031_p8)
}
  0x2d   : > { %s1252_s13 = smov 64   ;;  %s1253_s14 = smov 4  }
  0x2e   : > { %s1627_s2 = sld [smem:[#allocation26_spill]]  ;;  %s37_s17 = sadd.s32 1, %s1241_s26 }
  0x2f   : > { %s40_s21 = sadd.s32 1, %s1245_s27  ;;  %p38_p6 = scmp.ge.s32.totalorder %s37_s17, 2 }
  0x30   : > { %s49_s30 = sadd.s32 1, %s1229_s23  ;;  %p56_p9 = scmp.ne.s32.totalorder %s1229_s23, %s1225_s22 }
  0x31   : > { %p57_p10 = scmp.eq.s32.totalorder %s1249_s28, 0  ;;  %s1657_s17 = smov (%p38_p6, %s37_s17), 0 }
  0x32   : > { %1628 = sst [smem:[#allocation23_spill]] %s1657_s17  ;;  %s1659_s21 = smov (!%p38_p6, %s40_s21), %s1245_s27 }
  0x33   : > { %s45_s10 = ssub.s32 %s1241_s26, %s1657_s17  ;;  %p1396_p12 = por %p57_p10, %p56_p9 }
  0x34   : > { %878 = dma.hbm_to_vmem [thread:$0]  (!%p876_p13), %s1627_s2, 512, %s208_s11, [#allocation8], %s1252_s13, %s1252_s13, %s1253_s14  }
  0x35   : > { %p42_p13 = scmp.ge.s32.totalorder %s1659_s21, 2  ;;  %s145_s11 = sadd.s32 1, %s1217_s20 }
  0x36   : > { %p894_p0 = scmp.lt.s32.totalorder %s1249_s28, 4  ;;  %s224_s13 = sand.u32 1, %s1229_s23  }
  0x37   : > { %s1661_s21 = smov (%p42_p13, %s1659_s21), 0  ;;  %s1405_s14 = sshll.u32 %s224_s13, 2 }
  0x38   : > { %s44_s15 = ssub.s32 %s1245_s27, %s1661_s21  ;;  %s799_s2 = sshll.u32 %s1245_s27, 1 }
  0x39   : > { %s46_s16 = sor.u32 %s45_s10, %s44_s15  ;;  %p143_p2 = scmp.eq.s32.totalorder %s44_s15, 0 }
  0x3a   : > { %p47_p3 = scmp.eq.s32.totalorder %s46_s16, 0  ;;  %s233_s18 = sadd.s32 %s1241_s26, %s799_s2 }
  0x3b   : > { %s1411_s17 = scalar_select %p143_p2, %s1217_s20, %s145_s11  }
  0x3c   : > { %s1414_s8 = scalar_select %p47_p3, %s1229_s23, %s49_s30  }
  0x3d   : > { %s228_s5 = scalar_lea.vmem [#allocation4], %s1405_s14  ;;  %s800_s7 = sshll.u32 %s233_s18, 6 }
  0x3e   : > { %s237_s4 = sshll.u32 %s228_s5, 4  ;;  %s1630_s0 = sld [smem:[#allocation24_spill]]  ;;  %s238_s4 = int_to_ptr.vmem [resolvable:$true] %s237_s4 }
  0x3f   : > { %p1425_p5 = pnand %p894_p0, %p1396_p12  ;;  %s1632_s1 = sld [smem:[#allocation25_spill]] }
  0x40   : > { %s244_s5 = sand.u32 1, %s1249_s28   ;;  %s225_s18 = scalar_lea.sflag [#allocation5], %s224_s13 }
  0x41   : > { %p1037_p7 = pneg %p1425_p5  ;;  %s1048_s30 = scalar_lea.vmem %s238_s4, 64 }
  0x42   : > { %p1049_p8 = scmp.ne.s32.totalorder %s238_s4, %s1048_s30  ;;  %s1254_s3 = smov [#allocation4]  }
  0x43   : > { %s1053_s25 = sshll.u32 %s1254_s3, 4  ;;  %s1054_s25 = int_to_ptr.vmem [resolvable:$false] %s1053_s25 }
  0x44   : > { %s235_s24 = scalar_lea.hbm %s1630_s0, %s800_s7  ;;  %p1051_p6 = pnand %p1049_p8, %p1037_p7 }
  0x45   : > { %s1432_s2 = scalar_lea.hbm %s1632_s1, %s800_s7  ;;  %s1055_s12 = scalar_lea.vmem %s1054_s25, 128 }
  0x46   : > { %p1052_p9 = pneg %p1051_p6  ;;  %p1056_p10 = scmp.lt.s32.totalorder %s238_s4, %s1054_s25 }
  0x47   : > { %p1057_p12 = scmp.lt.s32.totalorder %s1055_s12, %s1048_s30 }
  0x49   : > { %p1058_p13 = por %p1057_p12, %p1056_p10 }
  0x4b   : > { %p1059_p0 = pnand %p1058_p13, %p1052_p9 }
  0x4d   : > { %1062 = shalt.err (!%p1059_p0)
}
  0x4e   : > { %882 = dma.hbm_to_vmem [thread:$0]  (!%p1425_p5), %s235_s24, 64, %s238_s4, %s225_s18  }
  0x4f   : > { %s248_s7 = scalar_lea.vmem [#allocation7], %s1405_s14  ;;  %s245_s16 = scalar_lea.sflag [#allocation8], %s244_s5 }
  0x50   : > { %s257_s13 = sshll.u32 %s248_s7, 4  ;;  %s1255_s11 = smov [#allocation7]   ;;  %s258_s13 = int_to_ptr.vmem [resolvable:$true] %s257_s13 }
  0x51   : > { %s1076_s15 = scalar_lea.vmem %s258_s13, 64  ;;  %s1081_s30 = sshll.u32 %s1255_s11, 4  ;;  %s1082_s30 = int_to_ptr.vmem [resolvable:$false] %s1081_s30 }
  0x52   : > { %p1077_p2 = scmp.ne.s32.totalorder %s258_s13, %s1076_s15  ;;  %s1083_s3 = scalar_lea.vmem %s1082_s30, 128 }
  0x53   : > { %p1084_p6 = scmp.lt.s32.totalorder %s258_s13, %s1082_s30  ;;  %p1085_p9 = scmp.lt.s32.totalorder %s1083_s3, %s1076_s15 }
  0x54   : > { %p1079_p3 = pnand %p1077_p2, %p1037_p7 }
  0x55   : > { %p1086_p10 = por %p1085_p9, %p1084_p6 }
  0x56   : > { %p1080_p8 = pneg %p1079_p3 }
  0x58   : > { %p1087_p12 = pnand %p1086_p10, %p1080_p8 }
  0x5a   : > { %1090 = shalt.err (!%p1087_p12)
}
  0x5b   : > { %885 = dma.hbm_to_vmem [thread:$0]  (!%p1425_p5), %s1432_s2, 64, %s258_s13, %s245_s16  }
  0x5c   : > { %266 = sbr.rel (%p1374_p11) target bundleno = 825 (0x339), region = 36  ;;  %s268_s4 = sand.u32 (!%p1374_p11), 1, %s1225_s22  }
  0x5d   : > { %s1452_s24 = sshll.u32 (!%p1374_p11), %s268_s4, 2  ;;  %s269_s14 = scalar_lea.sflag (!%p1374_p11), [#allocation5], %s268_s4 }
  0x5e   : > { %s272_s5 = scalar_lea.vmem (!%p1374_p11), [#allocation4], %s1452_s24 }
  0x61   : > { %1188 = dma.done.wait (%p1358_p4), %s269_s14, 64  }
  0x62   : > { %1190 = vsyncadd (%p1358_p4), %s269_s14, 4294967232  ;;  %s277_s10 = sand.u32 1, %s1348_s29   ;;  %s281_s9 = scalar_lea.vmem [#allocation7], %s1452_s24 }
  0x63   : > { %s278_s2 = scalar_lea.sflag [#allocation8], %s277_s10 }
  0x64   : > { %1192 = dma.done.wait (%p1358_p4), %s278_s2, 64  }
  0x65   : > { %1194 = vsyncadd (%p1358_p4), %s278_s2, 4294967232 }
  0x66   : > { %1196 = dma.done.wait (%p63_p1), [#allocation8], 512  }
  0x67   : > { %1198 = vsyncadd (%p63_p1), [#allocation8], 4294966784  ;;  %s1470_s18 = sand.u32 1, %s1213_s19   ;;  %s1633_s13 = sld [smem:[#allocation19_spill]] }
  0x68   : > { %s808_s25 = sshll.u32 %s1470_s18, 5  ;;  %s320_s7 = scalar_lea.vmem [#allocation11], %s1470_s18 }
  0x69   : > { %s1473_s12 = scalar_lea.vmem [#allocation10], %s808_s25 }
  0x6d   : > { %p809_p11 = scmp.ne.s32.totalorder %s1633_s13, 0 }
  0x6f   : > { %325 = sbr.rel (%p809_p11) target bundleno = 120 (0x78), region = 52 }
  0x74   : > { %vm326_vm0 = vcmask 261120   ;;  %vm331_vm1 = vcmask 253952   ;;  %v1256_v0 = vmov 0.0  }
  0x75   : > { %327 = vst.msk [vmem:[#allocation2] sm:$0xff] %vm326_vm0, %v1256_v0  ;;  %328 = vst.msk [vmem:[#allocation2 + $0x8] sm:$0xff] %vm326_vm0, %v1256_v0 }
  0x76   : > { %329 = vst.msk [vmem:[#allocation2 + $0x10] sm:$0xff] %vm326_vm0, %v1256_v0  ;;  %330 = vst.msk [vmem:[#allocation2 + $0x18] sm:$0xff] %vm326_vm0, %v1256_v0 }
  0x77   : > { %332 = vst.msk [vmem:[#allocation3] sm:$0x1] %vm331_vm1, %v1256_v0 }
  0x78 PF: > { %v995_v1 = vld [vmem:[#allocation9 + $0x8] sm:$0xff]   ;;  %v1257_v2 = vmov 0.0   ;;  %v996_v3 = vld [vmem:[#allocation9] sm:$0xff]   ;;  %v997_v4 = vld [vmem:[#allocation9 + $0x18] sm:$0xff]   ;;  %vm1258_vm2 = vmmov 0   ;;  %vm357_vm3 = vcmask 261120  }
  0x79   : > { %840 = vmatprep.subr.bf16.mxu0 %v1257_v2  ;;  %848 = vmatprep.subr.bf16.mxu1 %v1257_v2  ;;  %v998_v5 = vld [vmem:[#allocation9 + $0x10] sm:$0xff]   ;;  %v413_v7 = vld [vmem:[%s281_s9] sm:$0xf]  ;;  %s1634_s16 = sld [smem:[#allocation27_spill]]  ;;  %s1259_s30 = smov 96   ;;  %vm528_vm4 = vcmask 1043456  }
  0x7a   : > { %841 = vmatpush3.bf16.msra.mxu0 %v995_v1  ;;  %844 = vmatprep.mubr.msk.bf16.mxu0 %vm1258_vm2, %v1257_v2  ;;  %v333_v6 = vld [vmem:[%s272_s5] sm:$0xf]  ;;  %vm598_vm6 = vcmask 253952   ;;  %vm521_vm7 = vcmask 64512   ;;  %s1635_s3 = sld [smem:[#allocation19_spill]] }
  0x7b   : > { %842 = vmatprep.subr.bf16.mxu0 %v1257_v2  ;;  %852 = vmatprep.mubr.msk.bf16.mxu1 %vm1258_vm2, %v1257_v2 }
  0x7c   : > { %849 = vmatpush3.bf16.msra.mxu1 %v997_v4  ;;  %v499_v54 = vld [vmem:[#allocation2] sm:$0xff]  ;;  %v500_v60 = vld [vmem:[#allocation2 + $0x8] sm:$0xff] }
  0x7d   : > { %850 = vmatprep.subr.bf16.mxu1 %v1257_v2  ;;  %v501_v52 = vld [vmem:[#allocation2 + $0x10] sm:$0xff]  ;;  %v502_v57 = vld [vmem:[#allocation2 + $0x18] sm:$0xff] }
  0x7e   : > { %843 = vmatpush3.bf16.msra.mxu0 %v996_v3  ;;  %v589_v47 = vld [vmem:[#allocation3] sm:$0x1] }
  0x7f   : > { %v810_v8 = vld [vmem:[%s1634_s16] ss:$0 sm:$0xff]  ;;  %v816_v10 = vld [vmem:[%s1634_s16 + $0x1] ss:$0 sm:$0xff] }
  0x80   : > { %851 = vmatpush3.bf16.msra.mxu1 %v998_v5  ;;  %p823_p1 = scmp.ne.s32.totalorder %s1635_s3, 1 }
  0x81   : > { %845 = vmatmul.mubr.msk.bf16.vlgmr.msra.gmra.mxu0 %vm357_vm3, %v333_v6 }
  0x83   : > { %853 = vmatmul.mubr.msk.bf16.vlgmr.msra.gmra.mxu1 %vm357_vm3, %v413_v7 }
 0x141   : > { %v395_v9 = vpop.f32.mrf.mxu0 }
 0x142   : > { %v396_v11 = vadd.f32 %v810_v8, %v395_v9 }
 0x143   : > { %v846_v12 = vpop.f32.mrf.mxu0  ;;  %v476_v13 = vpop.f32.mrf.mxu1 }
 0x144   : > { %409 = vrot.lane.b32.xlu0 %v396_v11, %s1259_s30  ;;  %v477_v14 = vadd.f32 %v816_v10, %v476_v13  ;;  %v814_v20 = vmul.f32 -1.442695, %v396_v11 }
 0x145   : > { %v398_v15 = vpop.f32.mrf.mxu0  ;;  %v854_v16 = vpop.f32.mrf.mxu1 }
 0x146   : > { %v820_v21 = vmul.f32 -1.442695, %v477_v14  ;;  %999 = vpow2.f32 %v814_v20 }
 0x147   : > { %v847_v17 = vpop.f32.mrf.mxu0  ;;  %v479_v18 = vpop.f32.mrf.mxu1 }
 0x148   : > { %490 = vrot.lane.b32.xlu0 %v477_v14, %s1259_s30  ;;  %1001 = vpow2.f32 %v820_v21 }
 0x149   : > { %v855_v19 = vpop.f32.mrf.mxu1 }
 0x153   : > { %v1000_v22 = vpop.eup %999 }
 0x154   : > { %v404_v24 = vadd.f32 1.0, %v1000_v22 }
 0x155   : > { %v1002_v23 = vpop.eup %1001 }
 0x156   : > { %v485_v25 = vadd.f32 1.0, %v1002_v23  ;;  %1003 = vrcp.f32 %v404_v24 }
 0x158   : > { %1005 = vrcp.f32 %v485_v25 }
 0x163   : > { %v1004_v26 = vpop.eup %1003 }
 0x164   : > { %v407_v28 = vmul.f32 %v1004_v26, %v396_v11 }
 0x165   : > { %v1006_v27 = vpop.eup %1005 }
 0x166   : > { %v488_v31 = vmul.f32 %v1006_v27, %v477_v14 }
 0x1b6   : > { %v410_v29 = vpop.permute.xlu0 %409 }
 0x1b7   : > { %v412_v30 = vmul.f32 %v410_v29, %v407_v28 }
 0x1b9   : > { %v496_v32 = vmul.f32 1.442695, %v412_v30  ;;  %v495_v37 = vadd.f32 1.0, %v412_v30  ;;  %vm494_vm5 = vcmp.gt.f32.partialorder %v412_v30, 0.0 }
 0x1ba   : > { %v491_v33 = vpop.permute.xlu0 %490 }
 0x1bb   : > { %1007 = vpow2.f32 %v496_v32  ;;  %v493_v34 = vmul.f32 %v491_v33, %v488_v31 }
 0x1bd   : > { %v504_v35 = vpack.c.bf16 %v493_v34, %v493_v34 }
 0x1bf   : > { %v530_v36 = vsel %vm528_vm4, %v504_v35, 0  ;;  %862 = vmatprep.subr.msk.bf16.mxu0 %vm528_vm4, %v504_v35 }
 0x1c0   : > { %857 = vmatpush3.bf16.msra.mxu0 %v530_v36 }
 0x1c8   : > { %v1008_v38 = vpop.eup %1007 }
 0x1c9   : > { %v498_v39 = vsel %vm494_vm5, %v495_v37, %v1008_v38 }
 0x1ca   : > { %v503_v40 = vpack.c.bf16 %v498_v39, %v498_v39  ;;  %v590_v41 = vsel %vm357_vm3, %v498_v39, 0.0 }
 0x1cb   : > { %v591_v42 = vrot.slane %v590_v41, 4 }
 0x1cc   : > { %505 = vxpose.xlu1.c.b16.start.end [1/1] (short) (narrow) %v503_v40, 32 }
 0x1cd   : > { %v592_v43 = vadd.f32 %v591_v42, %v590_v41 }
 0x1cf   : > { %v593_v44 = vrot.slane %v592_v43, 2 }
 0x1d1   : > { %v594_v45 = vadd.f32 %v593_v44, %v592_v43 }
 0x1d3   : > { %v595_v46 = vrot.slane %v594_v45, 1 }
 0x1d5   : > { %v596_v48 = vadd.f32 %v595_v46, %v594_v45 }
 0x1d7   : > { %v597_v49 = vadd.f32 %v596_v48, %v589_v47 }
 0x1d9   : > { %599 = vst.msk [vmem:[#allocation3] sm:$0x1] %vm598_vm6, %v597_v49 }
 0x22e   : > { %v513_v50 = vpop.trf.xlu1 }
 0x22f   : > { %858 = vmatprep.mubr.msk.bf16.mxu0 %vm521_vm7, %v513_v50 }
 0x232   : > { %v514_v51 = vpop.trf.xlu1 }
 0x233   : > { %859 = vmatmul.mubr.msk.bf16.vlgmr.msra.gmra.mxu0 %vm521_vm7, %v514_v51 }
 0x2f3   : > { %v860_v53 = vpop.f32.mrf.mxu0 }
 0x2f4   : > { %v583_v55 = vadd.f32 %v860_v53, %v501_v52 }
 0x2f5   : > { %v566_v56 = vpop.f32.mrf.mxu0 }
 0x2f6   : > { %587 = vst.msk [vmem:[#allocation2 + $0x10] sm:$0xff] %vm357_vm3, %v583_v55  ;;  %v581_v58 = vadd.f32 %v566_v56, %v499_v54 }
 0x2f7   : > { %v861_v59 = vpop.f32.mrf.mxu0 }
 0x2f8   : > { %585 = vst.msk [vmem:[#allocation2] sm:$0xff] %vm357_vm3, %v581_v58  ;;  %v584_v61 = vadd.f32 %v861_v59, %v502_v57  ;;  %603 = sbr.rel (%p823_p1) target bundleno = 773 (0x305), region = 56 }
 0x2f9   : > { %v569_v62 = vpop.f32.mrf.mxu0 }
 0x2fa   : > { %588 = vst.msk [vmem:[#allocation2 + $0x18] sm:$0xff] %vm357_vm3, %v584_v61  ;;  %v582_v63 = vadd.f32 %v569_v62, %v500_v60 }
 0x2fc   : > { %586 = vst.msk [vmem:[#allocation2 + $0x8] sm:$0xff] %vm357_vm3, %v582_v63 }
 0x2fd   : > { %v606_v2 = vld [vmem:[#allocation2 + $0x10] sm:$0xff]  ;;  %v612_v4 = vld [vmem:[#allocation3] sm:$0x1] }
 0x2fe   : > { %610 = vst.msk [vmem:[%s1473_s12 + $0x10] sm:$0xff] %vm357_vm3, %v606_v2 }
 0x2ff   : > { %v604_v0 = vld [vmem:[#allocation2] sm:$0xff]  ;;  %613 = vst.msk [vmem:[%s320_s7] sm:$0x1] %vm598_vm6, %v612_v4 }
 0x300   : > { %608 = vst.msk [vmem:[%s1473_s12] sm:$0xff] %vm357_vm3, %v604_v0 }
 0x301   : > { %v607_v3 = vld [vmem:[#allocation2 + $0x18] sm:$0xff] }
 0x302   : > { %611 = vst.msk [vmem:[%s1473_s12 + $0x18] sm:$0xff] %vm357_vm3, %v607_v3 }
 0x303   : > { %v605_v1 = vld [vmem:[#allocation2 + $0x8] sm:$0xff] }
 0x304   : > { %609 = vst.msk [vmem:[%s1473_s12 + $0x8] sm:$0xff] %vm357_vm3, %v605_v1 }
 0x305 PF: > { %s1636_s4 = sld [smem:[#allocation20_spill]]  ;;  %s632_s25 = sshll.u32 %s1473_s12, 4  ;;  %s1514_s25 = int_to_ptr.vmem [resolvable:$true] %s632_s25 }
 0x306   : > { %s1637_s24 = sld [smem:[#allocation21_spill]]  ;;  %s615_s13 = scalar_lea.sflag [#allocation6], %s1470_s18 }
 0x307   : > { %s1638_s2 = sld [smem:[#allocation28_spill]]  ;;  %s1091_s29 = scalar_lea.vmem %s1514_s25, 512 }
 0x308   : > { %p1092_p4 = scmp.ne.s32.totalorder %s1514_s25, %s1091_s29  ;;  %s1260_s6 = smov [#allocation10]  }
 0x309   : > { %s1095_s15 = sshll.u32 %s1260_s6, 4  ;;  %s1096_s15 = int_to_ptr.vmem [resolvable:$false] %s1095_s15 }
 0x30a   : > { %s1097_s11 = scalar_lea.vmem %s1096_s15, 1024  ;;  %p1098_p0 = scmp.lt.s32.totalorder %s1514_s25, %s1096_s15 }
 0x30b   : > { %s830_s14 = sshll.u32 %s1636_s4, 9  ;;  %p1099_p2 = scmp.lt.s32.totalorder %s1097_s11, %s1091_s29 }
 0x30c   : > { %p1639_p5 = scmp.ne.s32.totalorder %s1637_s24, 0 }
 0x30d   : > { %s1511_s9 = scalar_lea.hbm %s1638_s2, %s830_s14  ;;  %p1100_p3 = por %p1099_p2, %p1098_p0 }
 0x30e   : > { %p1093_p7 = pnand %p1092_p4, %p1639_p5 }
 0x310   : > { %p1094_p13 = pneg %p1093_p7 }
 0x312   : > { %p1101_p8 = pnand %p1100_p3, %p1094_p13 }
 0x314   : > { %1104 = shalt.err (!%p1101_p8)
}
 0x315   : > { %s1105_s12 = scalar_lea.hbm %s1511_s9, 512  ;;  %s1109_s14 = scalar_lea.hbm %s1638_s2, 1024 }
 0x316   : > { %p1106_p6 = scmp.ne.s32.totalorder %s1511_s9, %s1105_s12  ;;  %p1110_p12 = scmp.lt.s32.totalorder %s1511_s9, %s1638_s2 }
 0x317   : > { %p1111_p11 = scmp.lt.s32.totalorder %s1109_s14, %s1105_s12 }
 0x318   : > { %p1107_p9 = pnand %p1106_p6, %p1639_p5 }
 0x319   : > { %p1112_p1 = por %p1111_p11, %p1110_p12 }
 0x31a   : > { %p1108_p10 = pneg %p1107_p9 }
 0x31c   : > { %p1113_p4 = pnand %p1112_p1, %p1108_p10 }
 0x31e   : > { %1116 = shalt.err (!%p1113_p4)
}
 0x31f   : > { %s1261_s29 = smov 128   ;;  %s1262_s6 = smov 8  }
 0x320   : > { %871 = dma.vmem_to_hbm [thread:$0]  (%p1639_p5), %s1514_s25, 512, %s1511_s9, %s615_s13, %s1261_s29, %s1261_s29, %s1262_s6  }
 0x321   : > { %s827_s15 = sshll.u32 %s1636_s4, 4  ;;  %s648_s11 = sshll.u32 %s320_s7, 4  ;;  %s649_s11 = int_to_ptr.vmem [resolvable:$true] %s648_s11 }
 0x322   : > { %s1640_s3 = sld [smem:[#allocation29_spill]]  ;;  %s620_s5 = scalar_lea.sflag [#allocation12], %s1470_s18 }
 0x323   : > { %s1117_s10 = scalar_lea.vmem %s649_s11, 16  ;;  %s1263_s0 = smov [#allocation11]  }
 0x324   : > { %p1118_p7 = scmp.ne.s32.totalorder %s649_s11, %s1117_s10  ;;  %s1121_s1 = sshll.u32 %s1263_s0, 4  ;;  %s1122_s1 = int_to_ptr.vmem [resolvable:$false] %s1121_s1 }
 0x325   : > { %s1123_s2 = scalar_lea.vmem %s1122_s1, 32  ;;  %p1124_p2 = scmp.lt.s32.totalorder %s649_s11, %s1122_s1 }
 0x326   : > { %p1119_p13 = pnand %p1118_p7, %p1639_p5  ;;  %p1125_p3 = scmp.lt.s32.totalorder %s1123_s2, %s1117_s10 }
 0x328   : > { %s646_s14 = scalar_lea.hbm %s1640_s3, %s827_s15  ;;  %p1120_p0 = pneg %p1119_p13 }
 0x329   : > { %p1126_p8 = por %p1125_p3, %p1124_p2 }
 0x32b   : > { %p1127_p6 = pnand %p1126_p8, %p1120_p0 }
 0x32d   : > { %1130 = shalt.err (!%p1127_p6)
}
 0x32e   : > { %s1131_s7 = scalar_lea.hbm %s646_s14, 16  ;;  %s1135_s9 = scalar_lea.hbm %s1640_s3, 32 }
 0x32f   : > { %p1132_p9 = scmp.ne.s32.totalorder %s646_s14, %s1131_s7  ;;  %p1136_p11 = scmp.lt.s32.totalorder %s646_s14, %s1640_s3 }
 0x330   : > { %p1137_p1 = scmp.lt.s32.totalorder %s1135_s9, %s1131_s7 }
 0x331   : > { %p1133_p10 = pnand %p1132_p9, %p1639_p5 }
 0x332   : > { %p1138_p4 = por %p1137_p1, %p1136_p11 }
 0x333   : > { %p1134_p12 = pneg %p1133_p10 }
 0x335   : > { %p1139_p7 = pnand %p1138_p4, %p1134_p12 }
 0x337   : > { %1142 = shalt.err (!%p1139_p7)
}
 0x338   : > { %872 = dma.vmem_to_hbm [thread:$0]  (%p1639_p5), %s649_s11, 16, %s646_s14, %s620_s5  }
 0x339 PF: > { %s1641_s0 = sld [smem:[#allocation18_spill]]  ;;  %p896_p13 = scmp.ge.s32.totalorder %s1249_s28, 2 }
 0x33a   : > { %s1642_s1 = sld [smem:[#allocation22_spill]] }
 0x33f   : > { %s660_s2 = sand.u32 1, %s1641_s0  }
 0x340   : > { %p1643_p0 = scmp.ne.s32.totalorder %s1642_s1, 0  ;;  %s661_s29 = scalar_lea.sflag [#allocation6], %s660_s2 }
 0x342   : > { %p887_p2 = pnand %p896_p13, %p1643_p0 }
 0x344   : > { %p888_p3 = pneg %p887_p2 }
 0x346   : > { %1200 = dma.done.wait (%p888_p3), %s661_s29, 512  }
 0x347   : > { %1202 = vsyncadd (%p888_p3), %s661_s29, 4294966784  ;;  %s670_s6 = scalar_lea.sflag [#allocation12], %s660_s2 }
 0x348   : > { %1204 = dma.done.wait (%p888_p3), %s670_s6, 16  }
 0x349   : > { %1206 = vsyncadd (%p888_p3), %s670_s6, 4294967280  ;;  %s28_s28 = sadd.s32 1, %s1249_s28   ;;  %s1644_s15 = sld [smem:[#allocation23_spill]] }
 0x34a   : > { %p25_p8 = scmp.ge.s32.totalorder %s28_s28, 6   ;;  %s1645_s11 = smov %s1661_s21 }
 0x34b   : > { %s1646_s18 = smov %s1213_s19  ;;  %s1647_s19 = smov %s1217_s20 }
 0x34c   : > { %s1648_s20 = smov %s1411_s17  ;;  %s1649_s21 = smov %s1225_s22 }
 0x34d   : > { %s1650_s22 = smov %s1229_s23  ;;  %s1651_s23 = smov %s1414_s8 }
 0x34e   : > { %s1652_s24 = smov %s1241_s26  ;;  %s1653_s25 = smov %s1245_s27 }
 0x34f   : > { %s1654_s26 = smov %s1644_s15  ;;  %s1655_s27 = smov %s1645_s11 }
 0x350   :  { %27 = sbr.rel (!%p25_p8) target bundleno = 20 (0x14), region = 125 }
 0x355   :  { %674 = vsyncpa [#allocation5], 1 }
 0x356   :  { %676 = vsyncpa [#allocation5 + $0x1], 1 }
 0x357   :  { %677 = vsyncpa [#allocation8], 1 }
 0x358   :  { %679 = vsyncpa [#allocation8 + $0x1], 1 }
 0x359   :  { %680 = vsyncpa [#allocation6], 1 }
 0x35a   :  { %682 = vsyncpa [#allocation6 + $0x1], 1 }
 0x35b   :  { %683 = vsyncpa [#allocation12], 1 }
 0x35c   :  { %685 = vsyncpa [#allocation12 + $0x1], 1 }

</bundles_post_ra>
